<compile_context>
chip_gen: v7x
topology: tpu7x:2x2x1
jax: 0.10.0
libtpu: 0.0.40
codegen_flags: <defaults>
</compile_context>

<pallas_src>
import functools
import numpy as np
import jax
import jax.numpy as jnp
from jax.experimental import pallas as pl
from jax.experimental.pallas import tpu as pltpu


def _round_up(x, m):
    return ((x + m - 1) // m) * m


# ---------------- fused LSTM + linear + log_softmax kernel ----------------- #
def lyrics_rnn_kernel(x_ref, static_ref, mask_ref, wih_ref, whh_ref,
                      lw_ref, lb_ref, out_ref, gx_ref, h_ref, *, T, B, H):
    # Prologue: time-varying input projection for ALL timesteps in one MXU
    # pass, parked in VMEM scratch (not register-resident across the loop).
    gx_ref[...] = jnp.dot(x_ref[...], wih_ref[...],
                          preferred_element_type=jnp.float32)   # (T*B, 4H) f32

    static = static_ref[...]              # (B, 4H) f32: biases + artist + melody

    h = jnp.zeros((B, H), jnp.float32)
    c = jnp.zeros((B, H), jnp.float32)
    for t in range(T):                    # static unroll, T is small
        g = (gx_ref[pl.ds(t * B, B), :] + static
             + jnp.dot(h.astype(jnp.bfloat16), whh_ref[...],
                       preferred_element_type=jnp.float32))     # (B, 4H) f32
        # PyTorch gate order: i, f, g, o.  Gate math stays in f32 (v5e-safe).
        i_g = jax.nn.sigmoid(g[:, 0 * H:1 * H])
        f_g = jax.nn.sigmoid(g[:, 1 * H:2 * H])
        g_g = jnp.tanh(g[:, 2 * H:3 * H])
        o_g = jax.nn.sigmoid(g[:, 3 * H:4 * H])
        c = f_g * c + i_g * g_g
        h = o_g * jnp.tanh(c)
        h_ref[pl.ds(t * B, B), :] = h     # park per-step output in VMEM scratch

    # Epilogue: single pack/pad mask (rows with t >= input_len become zero),
    # then one fused classifier matmul + log_softmax over the padded vocab.
    h_all = h_ref[...] * mask_ref[...]                          # (T*B, H)
    logits = (jnp.dot(h_all.astype(jnp.bfloat16), lw_ref[...],
                      preferred_element_type=jnp.float32)
              + lb_ref[...])              # (T*B, Vpad); bias / -1e30 pad in f32
    m = jnp.max(logits, axis=-1, keepdims=True)
    z = logits - m
    lse = jnp.log(jnp.sum(jnp.exp(z), axis=-1, keepdims=True))
    out_ref[...] = z - lse                # lane-dense (T*B, Vpad) store


def lyrics_rnn_forward(x_emb, static, mask, w_emb, w_hh, lin_w, lin_b,
                       *, T, B, H, Vp):
    kernel = functools.partial(lyrics_rnn_kernel, T=T, B=B, H=H)
    vmem = lambda: pl.BlockSpec(memory_space=pltpu.MemorySpace.VMEM)
    return pl.pallas_call(
        kernel,
        out_shape=jax.ShapeDtypeStruct((T * B, Vp), jnp.float32),
        in_specs=[vmem() for _ in range(7)],
        out_specs=vmem(),
        scratch_shapes=[pltpu.VMEM((T * B, 4 * H), jnp.float32),   # gx
                        pltpu.VMEM((T * B, H), jnp.float32)],      # h per step
    )(x_emb, static, mask, w_emb, w_hh, lin_w, lin_b)


# ------------------------------ model glue --------------------------------- #
class LyricsRNNPallas:
    def __init__(self, key, input_size, output_size, pad_id, batch_size=8,
                 hidden_size=128, melody_len=40, word_embedding_size=32,
                 num_artists=10):
        self.input_size = input_size
        self.output_size = output_size
        self.pad_id = pad_id
        self.batch_size = batch_size
        self.hidden_size = hidden_size
        self.melody_len = melody_len
        self.word_embed_size = word_embedding_size
        self.num_artists = num_artists
        self.v_pad = _round_up(output_size, 128)                  # 50 -> 128

        H = hidden_size
        E = word_embedding_size
        A = num_artists
        M = melody_len
        D = E + A + M

        k_emb, k_ih, k_hh, k_bih, k_bhh, k_lw, k_lb = jax.random.split(key, 7)

        emb = jax.random.normal(k_emb, (input_size, E), jnp.float32)
        self.word_embed = emb.at[pad_id].set(0.0)                 # padding_idx row = 0

        s = 1.0 / np.sqrt(H)
        w_ih = jax.random.uniform(k_ih, (D, 4 * H), jnp.float32, -s, s)
        # Split input->gates weight by feature block: only the word-embedding
        # block is time-varying and goes through the in-kernel prologue matmul.
        self.w_emb = w_ih[:E].astype(jnp.bfloat16)                # (E, 4H) bf16
        self.w_art = w_ih[E:E + A]                                # (A, 4H) f32
        self.w_mel = w_ih[E + A:]                                 # (M, 4H) f32

        self.w_hh = jax.random.uniform(k_hh, (H, 4 * H), jnp.float32,
                                       -s, s).astype(jnp.bfloat16)
        b_ih = jax.random.uniform(k_bih, (4 * H,), jnp.float32, -s, s)
        b_hh = jax.random.uniform(k_bhh, (4 * H,), jnp.float32, -s, s)
        self.lstm_bias = (b_ih + b_hh).reshape(1, 4 * H)          # f32

        lw = jax.random.uniform(k_lw, (H, output_size), jnp.float32, -s, s)
        lb = jax.random.uniform(k_lb, (output_size,), jnp.float32, -s, s)
        # Classifier padded to lane-dense V; padded bias columns get -1e30 so
        # they vanish from the log_softmax normalizer (bias add kept in f32).
        self.lin_w = (jnp.zeros((H, self.v_pad), jnp.float32)
                      .at[:, :output_size].set(lw).astype(jnp.bfloat16))
        self.lin_b = (jnp.full((1, self.v_pad), -1e30, jnp.float32)
                      .at[0, :output_size].set(lb))

    def __call__(self, tokens, melody, artist, input_lens):
        B, T = tokens.shape
        assert B == self.batch_size
        # NOTE: no host-sync check on input_lens (device->host sync removed);
        # pad_packed semantics require max(input_lens) == T for the demo.

        # Time-major token gather -> time-varying features only (T*B, E).
        x_emb = jnp.take(self.word_embed, tokens.T.reshape(-1),
                         axis=0).astype(jnp.bfloat16)             # (T*B, E)

        # Time-invariant gate contribution, computed once per batch row:
        #   artist one-hot @ W_art  ==  row-gather of W_art
        #   melody @ W_mel          ==  one (B,40)x(40,4H) matmul
        art_contrib = jnp.take(self.w_art, artist, axis=0)        # (B, 4H)
        mel_contrib = jnp.dot(melody.astype(jnp.float32), self.w_mel)
        static = self.lstm_bias + art_contrib + mel_contrib       # (B, 4H) f32

        # pack/pad mask, hoisted out of the recurrence (time-major, (T*B,1)).
        mask = (jnp.arange(T, dtype=jnp.int32)[:, None]
                < input_lens.astype(jnp.int32)[None, :]).astype(jnp.float32)
        mask = mask.reshape(T * B, 1)

        out_flat = lyrics_rnn_forward(
            x_emb, static, mask, self.w_emb, self.w_hh,
            self.lin_w, self.lin_b,
            T=T, B=B, H=self.hidden_size, Vp=self.v_pad)          # (T*B, Vpad)

        # Dropout -> identity (eval).  Reorder to batch-first, drop pad cols.
        out = out_flat.reshape(T, B, self.v_pad).transpose(1, 0, 2)
        return out[:, :, :self.output_size]                       # (B, T, V)


# --------------------------------- main ------------------------------------ #
if __name__ == "__main__":
    key = jax.random.PRNGKey(0)
    k_model, k_tok, k_mel, k_art = jax.random.split(key, 4)

    VOCAB = 50
    OUT = 50
    PAD = 0
    B = 8
    T = 8
    H = 128
    EMB = 32
    N_ART = 10
    MEL = 40

    model = LyricsRNNPallas(k_model, input_size=VOCAB, output_size=OUT,
                            pad_id=PAD, batch_size=B, hidden_size=H,
                            melody_len=MEL, word_embedding_size=EMB,
                            num_artists=N_ART)

    tokens = jax.random.randint(k_tok, (B, T), 1, VOCAB, dtype=jnp.int32)
    melody = jax.random.normal(k_mel, (B, MEL), jnp.float32)
    artist = jax.random.randint(k_art, (B,), 0, N_ART, dtype=jnp.int32)
    input_lens = jnp.array([T, T, 7, 6, 5, T, 4, 3], dtype=jnp.int32)

    @jax.jit
    def forward(tok, mel, art, lens):
        return model(tok, mel, art, lens)

    out = forward(tokens, melody, artist, input_lens)
    jax.block_until_ready(out)
    assert out.shape == (B, T, OUT) and out.dtype == jnp.float32
    assert bool(jnp.all(jnp.isfinite(out)))
    print("KERNEL_OK")
</pallas_src>

<mosaic_0001>
module attributes {stable_mosaic.version = 11 : i64} {
  func.func @lyrics_rnn_kernel(%arg0: memref<64x32xbf16, #tpu.memory_space<vmem>>, %arg1: memref<8x512xf32, #tpu.memory_space<vmem>>, %arg2: memref<64x1xf32, #tpu.memory_space<vmem>>, %arg3: memref<32x512xbf16, #tpu.memory_space<vmem>>, %arg4: memref<128x512xbf16, #tpu.memory_space<vmem>>, %arg5: memref<128x128xbf16, #tpu.memory_space<vmem>>, %arg6: memref<1x128xf32, #tpu.memory_space<vmem>>, %arg7: memref<64x128xf32, #tpu.memory_space<vmem>>, %arg8: memref<64x512xf32, #tpu.memory_space<vmem>>, %arg9: memref<64x128xf32, #tpu.memory_space<vmem>>) attributes {dimension_semantics = [], scalar_prefetch = 0 : i64, scratch_operands = 2 : i64, tpu.core_type = #tpu.core_type<tc>} {
    %c0 = arith.constant 0 : index
    %c0_0 = arith.constant 0 : index
    %0 = vector.load %arg0[%c0, %c0_0] : memref<64x32xbf16, #tpu.memory_space<vmem>>, vector<64x32xbf16>
    %c0_1 = arith.constant 0 : index
    %c0_2 = arith.constant 0 : index
    %1 = vector.load %arg3[%c0_1, %c0_2] : memref<32x512xbf16, #tpu.memory_space<vmem>>, vector<32x512xbf16>
    %cst = arith.constant dense<0.000000e+00> : vector<64x512xf32>
    %2 = tpu.matmul %0, %1, %cst {dimension_numbers = #tpu.dot_dimension_numbers<[1], [0], [0], [1], [0, 0, 1, 1], [], []>} : vector<64x32xbf16>, vector<32x512xbf16>, vector<64x512xf32> -> vector<64x512xf32>
    %c0_3 = arith.constant 0 : index
    %c0_4 = arith.constant 0 : index
    %3 = vector.load %arg8[%c0_3, %c0_4] : memref<64x512xf32, #tpu.memory_space<vmem>>, vector<64x512xf32>
    tpu.vector_store %arg8[%c0_3, %c0_4], %2 {strides = array<i32>} : memref<64x512xf32, #tpu.memory_space<vmem>>, vector<64x512xf32>,
    %c0_5 = arith.constant 0 : index
    %c0_6 = arith.constant 0 : index
    %4 = vector.load %arg1[%c0_5, %c0_6] : memref<8x512xf32, #tpu.memory_space<vmem>>, vector<8x512xf32>
    %cst_7 = arith.constant 0.000000e+00 : f32
    %5 = vector.broadcast %cst_7 : f32 to vector<8x128xf32>
    %cst_8 = arith.constant 0.000000e+00 : f32
    %6 = vector.broadcast %cst_8 : f32 to vector<8x128xf32>
    %c0_9 = arith.constant 0 : index
    %c0_10 = arith.constant 0 : index
    %7 = vector.load %arg8[%c0_9, %c0_10] : memref<64x512xf32, #tpu.memory_space<vmem>>, vector<8x512xf32>
    %8 = arith.addf %7, %4 : vector<8x512xf32>
    %9 = arith.truncf %5 : vector<8x128xf32> to vector<8x128xbf16>
    %c0_11 = arith.constant 0 : index
    %c0_12 = arith.constant 0 : index
    %10 = vector.load %arg4[%c0_11, %c0_12] : memref<128x512xbf16, #tpu.memory_space<vmem>>, vector<128x512xbf16>
    %cst_13 = arith.constant dense<0.000000e+00> : vector<8x512xf32>
    %11 = tpu.matmul %9, %10, %cst_13 {dimension_numbers = #tpu.dot_dimension_numbers<[1], [0], [0], [1], [0, 0, 1, 1], [], []>} : vector<8x128xbf16>, vector<128x512xbf16>, vector<8x512xf32> -> vector<8x512xf32>
    %12 = arith.addf %8, %11 : vector<8x512xf32>
    %13 = vector.extract_strided_slice %12 {offsets = [0, 0], sizes = [8, 128], strides = [1, 1]} : vector<8x512xf32> to vector<8x128xf32>
    %14 = arith.negf %13 : vector<8x128xf32>
    %15 = math.exp %14 : vector<8x128xf32>
    %cst_14 = arith.constant 1.000000e+00 : f32
    %16 = vector.broadcast %cst_14 : f32 to vector<8x128xf32>
    %17 = arith.addf %16, %15 : vector<8x128xf32>
    %18 = arith.divf %16, %17 : vector<8x128xf32>
    %19 = vector.extract_strided_slice %12 {offsets = [0, 128], sizes = [8, 128], strides = [1, 1]} : vector<8x512xf32> to vector<8x128xf32>
    %20 = arith.negf %19 : vector<8x128xf32>
    %21 = math.exp %20 : vector<8x128xf32>
    %cst_15 = arith.constant 1.000000e+00 : f32
    %22 = vector.broadcast %cst_15 : f32 to vector<8x128xf32>
    %23 = arith.addf %22, %21 : vector<8x128xf32>
    %24 = arith.divf %22, %23 : vector<8x128xf32>
    %25 = vector.extract_strided_slice %12 {offsets = [0, 256], sizes = [8, 128], strides = [1, 1]} : vector<8x512xf32> to vector<8x128xf32>
    %26 = math.tanh %25 : vector<8x128xf32>
    %27 = vector.extract_strided_slice %12 {offsets = [0, 384], sizes = [8, 128], strides = [1, 1]} : vector<8x512xf32> to vector<8x128xf32>
    %28 = arith.negf %27 : vector<8x128xf32>
    %29 = math.exp %28 : vector<8x128xf32>
    %cst_16 = arith.constant 1.000000e+00 : f32
    %30 = vector.broadcast %cst_16 : f32 to vector<8x128xf32>
    %31 = arith.addf %30, %29 : vector<8x128xf32>
    %32 = arith.divf %30, %31 : vector<8x128xf32>
    %33 = arith.mulf %24, %6 : vector<8x128xf32>
    %34 = arith.mulf %18, %26 : vector<8x128xf32>
    %35 = arith.addf %33, %34 : vector<8x128xf32>
    %36 = math.tanh %35 : vector<8x128xf32>
    %37 = arith.mulf %32, %36 : vector<8x128xf32>
    %c0_17 = arith.constant 0 : index
    %c0_18 = arith.constant 0 : index
    %38 = vector.load %arg9[%c0_17, %c0_18] : memref<64x128xf32, #tpu.memory_space<vmem>>, vector<8x128xf32>
    tpu.vector_store %arg9[%c0_17, %c0_18], %37 {strides = array<i32>} : memref<64x128xf32, #tpu.memory_space<vmem>>, vector<8x128xf32>,
    %c8 = arith.constant 8 : index
    %c0_19 = arith.constant 0 : index
    %39 = vector.load %arg8[%c8, %c0_19] : memref<64x512xf32, #tpu.memory_space<vmem>>, vector<8x512xf32>
    %40 = arith.addf %39, %4 : vector<8x512xf32>
    %41 = arith.truncf %37 : vector<8x128xf32> to vector<8x128xbf16>
    %c0_20 = arith.constant 0 : index
    %c0_21 = arith.constant 0 : index
    %42 = vector.load %arg4[%c0_20, %c0_21] : memref<128x512xbf16, #tpu.memory_space<vmem>>, vector<128x512xbf16>
    %cst_22 = arith.constant dense<0.000000e+00> : vector<8x512xf32>
    %43 = tpu.matmul %41, %42, %cst_22 {dimension_numbers = #tpu.dot_dimension_numbers<[1], [0], [0], [1], [0, 0, 1, 1], [], []>} : vector<8x128xbf16>, vector<128x512xbf16>, vector<8x512xf32> -> vector<8x512xf32>
    %44 = arith.addf %40, %43 : vector<8x512xf32>
    %45 = vector.extract_strided_slice %44 {offsets = [0, 0], sizes = [8, 128], strides = [1, 1]} : vector<8x512xf32> to vector<8x128xf32>
    %46 = arith.negf %45 : vector<8x128xf32>
    %47 = math.exp %46 : vector<8x128xf32>
    %cst_23 = arith.constant 1.000000e+00 : f32
    %48 = vector.broadcast %cst_23 : f32 to vector<8x128xf32>
    %49 = arith.addf %48, %47 : vector<8x128xf32>
    %50 = arith.divf %48, %49 : vector<8x128xf32>
    %51 = vector.extract_strided_slice %44 {offsets = [0, 128], sizes = [8, 128], strides = [1, 1]} : vector<8x512xf32> to vector<8x128xf32>
    %52 = arith.negf %51 : vector<8x128xf32>
    %53 = math.exp %52 : vector<8x128xf32>
    %cst_24 = arith.constant 1.000000e+00 : f32
    %54 = vector.broadcast %cst_24 : f32 to vector<8x128xf32>
    %55 = arith.addf %54, %53 : vector<8x128xf32>
    %56 = arith.divf %54, %55 : vector<8x128xf32>
    %57 = vector.extract_strided_slice %44 {offsets = [0, 256], sizes = [8, 128], strides = [1, 1]} : vector<8x512xf32> to vector<8x128xf32>
    %58 = math.tanh %57 : vector<8x128xf32>
    %59 = vector.extract_strided_slice %44 {offsets = [0, 384], sizes = [8, 128], strides = [1, 1]} : vector<8x512xf32> to vector<8x128xf32>
    %60 = arith.negf %59 : vector<8x128xf32>
    %61 = math.exp %60 : vector<8x128xf32>
    %cst_25 = arith.constant 1.000000e+00 : f32
    %62 = vector.broadcast %cst_25 : f32 to vector<8x128xf32>
    %63 = arith.addf %62, %61 : vector<8x128xf32>
    %64 = arith.divf %62, %63 : vector<8x128xf32>
    %65 = arith.mulf %56, %35 : vector<8x128xf32>
    %66 = arith.mulf %50, %58 : vector<8x128xf32>
    %67 = arith.addf %65, %66 : vector<8x128xf32>
    %68 = math.tanh %67 : vector<8x128xf32>
    %69 = arith.mulf %64, %68 : vector<8x128xf32>
    %c8_26 = arith.constant 8 : index
    %c0_27 = arith.constant 0 : index
    %70 = vector.load %arg9[%c8_26, %c0_27] : memref<64x128xf32, #tpu.memory_space<vmem>>, vector<8x128xf32>
    tpu.vector_store %arg9[%c8_26, %c0_27], %69 {strides = array<i32>} : memref<64x128xf32, #tpu.memory_space<vmem>>, vector<8x128xf32>,
    %c16 = arith.constant 16 : index
    %c0_28 = arith.constant 0 : index
    %71 = vector.load %arg8[%c16, %c0_28] : memref<64x512xf32, #tpu.memory_space<vmem>>, vector<8x512xf32>
    %72 = arith.addf %71, %4 : vector<8x512xf32>
    %73 = arith.truncf %69 : vector<8x128xf32> to vector<8x128xbf16>
    %c0_29 = arith.constant 0 : index
    %c0_30 = arith.constant 0 : index
    %74 = vector.load %arg4[%c0_29, %c0_30] : memref<128x512xbf16, #tpu.memory_space<vmem>>, vector<128x512xbf16>
    %cst_31 = arith.constant dense<0.000000e+00> : vector<8x512xf32>
    %75 = tpu.matmul %73, %74, %cst_31 {dimension_numbers = #tpu.dot_dimension_numbers<[1], [0], [0], [1], [0, 0, 1, 1], [], []>} : vector<8x128xbf16>, vector<128x512xbf16>, vector<8x512xf32> -> vector<8x512xf32>
    %76 = arith.addf %72, %75 : vector<8x512xf32>
    %77 = vector.extract_strided_slice %76 {offsets = [0, 0], sizes = [8, 128], strides = [1, 1]} : vector<8x512xf32> to vector<8x128xf32>
    %78 = arith.negf %77 : vector<8x128xf32>
    %79 = math.exp %78 : vector<8x128xf32>
    %cst_32 = arith.constant 1.000000e+00 : f32
    %80 = vector.broadcast %cst_32 : f32 to vector<8x128xf32>
    %81 = arith.addf %80, %79 : vector<8x128xf32>
    %82 = arith.divf %80, %81 : vector<8x128xf32>
    %83 = vector.extract_strided_slice %76 {offsets = [0, 128], sizes = [8, 128], strides = [1, 1]} : vector<8x512xf32> to vector<8x128xf32>
    %84 = arith.negf %83 : vector<8x128xf32>
    %85 = math.exp %84 : vector<8x128xf32>
    %cst_33 = arith.constant 1.000000e+00 : f32
    %86 = vector.broadcast %cst_33 : f32 to vector<8x128xf32>
    %87 = arith.addf %86, %85 : vector<8x128xf32>
    %88 = arith.divf %86, %87 : vector<8x128xf32>
    %89 = vector.extract_strided_slice %76 {offsets = [0, 256], sizes = [8, 128], strides = [1, 1]} : vector<8x512xf32> to vector<8x128xf32>
    %90 = math.tanh %89 : vector<8x128xf32>
    %91 = vector.extract_strided_slice %76 {offsets = [0, 384], sizes = [8, 128], strides = [1, 1]} : vector<8x512xf32> to vector<8x128xf32>
    %92 = arith.negf %91 : vector<8x128xf32>
    %93 = math.exp %92 : vector<8x128xf32>
    %cst_34 = arith.constant 1.000000e+00 : f32
    %94 = vector.broadcast %cst_34 : f32 to vector<8x128xf32>
    %95 = arith.addf %94, %93 : vector<8x128xf32>
    %96 = arith.divf %94, %95 : vector<8x128xf32>
    %97 = arith.mulf %88, %67 : vector<8x128xf32>
    %98 = arith.mulf %82, %90 : vector<8x128xf32>
    %99 = arith.addf %97, %98 : vector<8x128xf32>
    %100 = math.tanh %99 : vector<8x128xf32>
    %101 = arith.mulf %96, %100 : vector<8x128xf32>
    %c16_35 = arith.constant 16 : index
    %c0_36 = arith.constant 0 : index
    %102 = vector.load %arg9[%c16_35, %c0_36] : memref<64x128xf32, #tpu.memory_space<vmem>>, vector<8x128xf32>
    tpu.vector_store %arg9[%c16_35, %c0_36], %101 {strides = array<i32>} : memref<64x128xf32, #tpu.memory_space<vmem>>, vector<8x128xf32>,
    %c24 = arith.constant 24 : index
    %c0_37 = arith.constant 0 : index
    %103 = vector.load %arg8[%c24, %c0_37] : memref<64x512xf32, #tpu.memory_space<vmem>>, vector<8x512xf32>
    %104 = arith.addf %103, %4 : vector<8x512xf32>
    %105 = arith.truncf %101 : vector<8x128xf32> to vector<8x128xbf16>
    %c0_38 = arith.constant 0 : index
    %c0_39 = arith.constant 0 : index
    %106 = vector.load %arg4[%c0_38, %c0_39] : memref<128x512xbf16, #tpu.memory_space<vmem>>, vector<128x512xbf16>
    %cst_40 = arith.constant dense<0.000000e+00> : vector<8x512xf32>
    %107 = tpu.matmul %105, %106, %cst_40 {dimension_numbers = #tpu.dot_dimension_numbers<[1], [0], [0], [1], [0, 0, 1, 1], [], []>} : vector<8x128xbf16>, vector<128x512xbf16>, vector<8x512xf32> -> vector<8x512xf32>
    %108 = arith.addf %104, %107 : vector<8x512xf32>
    %109 = vector.extract_strided_slice %108 {offsets = [0, 0], sizes = [8, 128], strides = [1, 1]} : vector<8x512xf32> to vector<8x128xf32>
    %110 = arith.negf %109 : vector<8x128xf32>
    %111 = math.exp %110 : vector<8x128xf32>
    %cst_41 = arith.constant 1.000000e+00 : f32
    %112 = vector.broadcast %cst_41 : f32 to vector<8x128xf32>
    %113 = arith.addf %112, %111 : vector<8x128xf32>
    %114 = arith.divf %112, %113 : vector<8x128xf32>
    %115 = vector.extract_strided_slice %108 {offsets = [0, 128], sizes = [8, 128], strides = [1, 1]} : vector<8x512xf32> to vector<8x128xf32>
    %116 = arith.negf %115 : vector<8x128xf32>
    %117 = math.exp %116 : vector<8x128xf32>
    %cst_42 = arith.constant 1.000000e+00 : f32
    %118 = vector.broadcast %cst_42 : f32 to vector<8x128xf32>
    %119 = arith.addf %118, %117 : vector<8x128xf32>
    %120 = arith.divf %118, %119 : vector<8x128xf32>
    %121 = vector.extract_strided_slice %108 {offsets = [0, 256], sizes = [8, 128], strides = [1, 1]} : vector<8x512xf32> to vector<8x128xf32>
    %122 = math.tanh %121 : vector<8x128xf32>
    %123 = vector.extract_strided_slice %108 {offsets = [0, 384], sizes = [8, 128], strides = [1, 1]} : vector<8x512xf32> to vector<8x128xf32>
    %124 = arith.negf %123 : vector<8x128xf32>
    %125 = math.exp %124 : vector<8x128xf32>
    %cst_43 = arith.constant 1.000000e+00 : f32
    %126 = vector.broadcast %cst_43 : f32 to vector<8x128xf32>
    %127 = arith.addf %126, %125 : vector<8x128xf32>
    %128 = arith.divf %126, %127 : vector<8x128xf32>
    %129 = arith.mulf %120, %99 : vector<8x128xf32>
    %130 = arith.mulf %114, %122 : vector<8x128xf32>
    %131 = arith.addf %129, %130 : vector<8x128xf32>
    %132 = math.tanh %131 : vector<8x128xf32>
    %133 = arith.mulf %128, %132 : vector<8x128xf32>
    %c24_44 = arith.constant 24 : index
    %c0_45 = arith.constant 0 : index
    %134 = vector.load %arg9[%c24_44, %c0_45] : memref<64x128xf32, #tpu.memory_space<vmem>>, vector<8x128xf32>
    tpu.vector_store %arg9[%c24_44, %c0_45], %133 {strides = array<i32>} : memref<64x128xf32, #tpu.memory_space<vmem>>, vector<8x128xf32>,
    %c32 = arith.constant 32 : index
    %c0_46 = arith.constant 0 : index
    %135 = vector.load %arg8[%c32, %c0_46] : memref<64x512xf32, #tpu.memory_space<vmem>>, vector<8x512xf32>
    %136 = arith.addf %135, %4 : vector<8x512xf32>
    %137 = arith.truncf %133 : vector<8x128xf32> to vector<8x128xbf16>
    %c0_47 = arith.constant 0 : index
    %c0_48 = arith.constant 0 : index
    %138 = vector.load %arg4[%c0_47, %c0_48] : memref<128x512xbf16, #tpu.memory_space<vmem>>, vector<128x512xbf16>
    %cst_49 = arith.constant dense<0.000000e+00> : vector<8x512xf32>
    %139 = tpu.matmul %137, %138, %cst_49 {dimension_numbers = #tpu.dot_dimension_numbers<[1], [0], [0], [1], [0, 0, 1, 1], [], []>} : vector<8x128xbf16>, vector<128x512xbf16>, vector<8x512xf32> -> vector<8x512xf32>
    %140 = arith.addf %136, %139 : vector<8x512xf32>
    %141 = vector.extract_strided_slice %140 {offsets = [0, 0], sizes = [8, 128], strides = [1, 1]} : vector<8x512xf32> to vector<8x128xf32>
    %142 = arith.negf %141 : vector<8x128xf32>
    %143 = math.exp %142 : vector<8x128xf32>
    %cst_50 = arith.constant 1.000000e+00 : f32
    %144 = vector.broadcast %cst_50 : f32 to vector<8x128xf32>
    %145 = arith.addf %144, %143 : vector<8x128xf32>
    %146 = arith.divf %144, %145 : vector<8x128xf32>
    %147 = vector.extract_strided_slice %140 {offsets = [0, 128], sizes = [8, 128], strides = [1, 1]} : vector<8x512xf32> to vector<8x128xf32>
    %148 = arith.negf %147 : vector<8x128xf32>
    %149 = math.exp %148 : vector<8x128xf32>
    %cst_51 = arith.constant 1.000000e+00 : f32
    %150 = vector.broadcast %cst_51 : f32 to vector<8x128xf32>
    %151 = arith.addf %150, %149 : vector<8x128xf32>
    %152 = arith.divf %150, %151 : vector<8x128xf32>
    %153 = vector.extract_strided_slice %140 {offsets = [0, 256], sizes = [8, 128], strides = [1, 1]} : vector<8x512xf32> to vector<8x128xf32>
    %154 = math.tanh %153 : vector<8x128xf32>
    %155 = vector.extract_strided_slice %140 {offsets = [0, 384], sizes = [8, 128], strides = [1, 1]} : vector<8x512xf32> to vector<8x128xf32>
    %156 = arith.negf %155 : vector<8x128xf32>
    %157 = math.exp %156 : vector<8x128xf32>
    %cst_52 = arith.constant 1.000000e+00 : f32
    %158 = vector.broadcast %cst_52 : f32 to vector<8x128xf32>
    %159 = arith.addf %158, %157 : vector<8x128xf32>
    %160 = arith.divf %158, %159 : vector<8x128xf32>
    %161 = arith.mulf %152, %131 : vector<8x128xf32>
    %162 = arith.mulf %146, %154 : vector<8x128xf32>
    %163 = arith.addf %161, %162 : vector<8x128xf32>
    %164 = math.tanh %163 : vector<8x128xf32>
    %165 = arith.mulf %160, %164 : vector<8x128xf32>
    %c32_53 = arith.constant 32 : index
    %c0_54 = arith.constant 0 : index
    %166 = vector.load %arg9[%c32_53, %c0_54] : memref<64x128xf32, #tpu.memory_space<vmem>>, vector<8x128xf32>
    tpu.vector_store %arg9[%c32_53, %c0_54], %165 {strides = array<i32>} : memref<64x128xf32, #tpu.memory_space<vmem>>, vector<8x128xf32>,
    %c40 = arith.constant 40 : index
    %c0_55 = arith.constant 0 : index
    %167 = vector.load %arg8[%c40, %c0_55] : memref<64x512xf32, #tpu.memory_space<vmem>>, vector<8x512xf32>
    %168 = arith.addf %167, %4 : vector<8x512xf32>
    %169 = arith.truncf %165 : vector<8x128xf32> to vector<8x128xbf16>
    %c0_56 = arith.constant 0 : index
    %c0_57 = arith.constant 0 : index
    %170 = vector.load %arg4[%c0_56, %c0_57] : memref<128x512xbf16, #tpu.memory_space<vmem>>, vector<128x512xbf16>
    %cst_58 = arith.constant dense<0.000000e+00> : vector<8x512xf32>
    %171 = tpu.matmul %169, %170, %cst_58 {dimension_numbers = #tpu.dot_dimension_numbers<[1], [0], [0], [1], [0, 0, 1, 1], [], []>} : vector<8x128xbf16>, vector<128x512xbf16>, vector<8x512xf32> -> vector<8x512xf32>
    %172 = arith.addf %168, %171 : vector<8x512xf32>
    %173 = vector.extract_strided_slice %172 {offsets = [0, 0], sizes = [8, 128], strides = [1, 1]} : vector<8x512xf32> to vector<8x128xf32>
    %174 = arith.negf %173 : vector<8x128xf32>
    %175 = math.exp %174 : vector<8x128xf32>
    %cst_59 = arith.constant 1.000000e+00 : f32
    %176 = vector.broadcast %cst_59 : f32 to vector<8x128xf32>
    %177 = arith.addf %176, %175 : vector<8x128xf32>
    %178 = arith.divf %176, %177 : vector<8x128xf32>
    %179 = vector.extract_strided_slice %172 {offsets = [0, 128], sizes = [8, 128], strides = [1, 1]} : vector<8x512xf32> to vector<8x128xf32>
    %180 = arith.negf %179 : vector<8x128xf32>
    %181 = math.exp %180 : vector<8x128xf32>
    %cst_60 = arith.constant 1.000000e+00 : f32
    %182 = vector.broadcast %cst_60 : f32 to vector<8x128xf32>
    %183 = arith.addf %182, %181 : vector<8x128xf32>
    %184 = arith.divf %182, %183 : vector<8x128xf32>
    %185 = vector.extract_strided_slice %172 {offsets = [0, 256], sizes = [8, 128], strides = [1, 1]} : vector<8x512xf32> to vector<8x128xf32>
    %186 = math.tanh %185 : vector<8x128xf32>
    %187 = vector.extract_strided_slice %172 {offsets = [0, 384], sizes = [8, 128], strides = [1, 1]} : vector<8x512xf32> to vector<8x128xf32>
    %188 = arith.negf %187 : vector<8x128xf32>
    %189 = math.exp %188 : vector<8x128xf32>
    %cst_61 = arith.constant 1.000000e+00 : f32
    %190 = vector.broadcast %cst_61 : f32 to vector<8x128xf32>
    %191 = arith.addf %190, %189 : vector<8x128xf32>
    %192 = arith.divf %190, %191 : vector<8x128xf32>
    %193 = arith.mulf %184, %163 : vector<8x128xf32>
    %194 = arith.mulf %178, %186 : vector<8x128xf32>
    %195 = arith.addf %193, %194 : vector<8x128xf32>
    %196 = math.tanh %195 : vector<8x128xf32>
    %197 = arith.mulf %192, %196 : vector<8x128xf32>
    %c40_62 = arith.constant 40 : index
    %c0_63 = arith.constant 0 : index
    %198 = vector.load %arg9[%c40_62, %c0_63] : memref<64x128xf32, #tpu.memory_space<vmem>>, vector<8x128xf32>
    tpu.vector_store %arg9[%c40_62, %c0_63], %197 {strides = array<i32>} : memref<64x128xf32, #tpu.memory_space<vmem>>, vector<8x128xf32>,
    %c48 = arith.constant 48 : index
    %c0_64 = arith.constant 0 : index
    %199 = vector.load %arg8[%c48, %c0_64] : memref<64x512xf32, #tpu.memory_space<vmem>>, vector<8x512xf32>
    %200 = arith.addf %199, %4 : vector<8x512xf32>
    %201 = arith.truncf %197 : vector<8x128xf32> to vector<8x128xbf16>
    %c0_65 = arith.constant 0 : index
    %c0_66 = arith.constant 0 : index
    %202 = vector.load %arg4[%c0_65, %c0_66] : memref<128x512xbf16, #tpu.memory_space<vmem>>, vector<128x512xbf16>
    %cst_67 = arith.constant dense<0.000000e+00> : vector<8x512xf32>
    %203 = tpu.matmul %201, %202, %cst_67 {dimension_numbers = #tpu.dot_dimension_numbers<[1], [0], [0], [1], [0, 0, 1, 1], [], []>} : vector<8x128xbf16>, vector<128x512xbf16>, vector<8x512xf32> -> vector<8x512xf32>
    %204 = arith.addf %200, %203 : vector<8x512xf32>
    %205 = vector.extract_strided_slice %204 {offsets = [0, 0], sizes = [8, 128], strides = [1, 1]} : vector<8x512xf32> to vector<8x128xf32>
    %206 = arith.negf %205 : vector<8x128xf32>
    %207 = math.exp %206 : vector<8x128xf32>
    %cst_68 = arith.constant 1.000000e+00 : f32
    %208 = vector.broadcast %cst_68 : f32 to vector<8x128xf32>
    %209 = arith.addf %208, %207 : vector<8x128xf32>
    %210 = arith.divf %208, %209 : vector<8x128xf32>
    %211 = vector.extract_strided_slice %204 {offsets = [0, 128], sizes = [8, 128], strides = [1, 1]} : vector<8x512xf32> to vector<8x128xf32>
    %212 = arith.negf %211 : vector<8x128xf32>
    %213 = math.exp %212 : vector<8x128xf32>
    %cst_69 = arith.constant 1.000000e+00 : f32
    %214 = vector.broadcast %cst_69 : f32 to vector<8x128xf32>
    %215 = arith.addf %214, %213 : vector<8x128xf32>
    %216 = arith.divf %214, %215 : vector<8x128xf32>
    %217 = vector.extract_strided_slice %204 {offsets = [0, 256], sizes = [8, 128], strides = [1, 1]} : vector<8x512xf32> to vector<8x128xf32>
    %218 = math.tanh %217 : vector<8x128xf32>
    %219 = vector.extract_strided_slice %204 {offsets = [0, 384], sizes = [8, 128], strides = [1, 1]} : vector<8x512xf32> to vector<8x128xf32>
    %220 = arith.negf %219 : vector<8x128xf32>
    %221 = math.exp %220 : vector<8x128xf32>
    %cst_70 = arith.constant 1.000000e+00 : f32
    %222 = vector.broadcast %cst_70 : f32 to vector<8x128xf32>
    %223 = arith.addf %222, %221 : vector<8x128xf32>
    %224 = arith.divf %222, %223 : vector<8x128xf32>
    %225 = arith.mulf %216, %195 : vector<8x128xf32>
    %226 = arith.mulf %210, %218 : vector<8x128xf32>
    %227 = arith.addf %225, %226 : vector<8x128xf32>
    %228 = math.tanh %227 : vector<8x128xf32>
    %229 = arith.mulf %224, %228 : vector<8x128xf32>
    %c48_71 = arith.constant 48 : index
    %c0_72 = arith.constant 0 : index
    %230 = vector.load %arg9[%c48_71, %c0_72] : memref<64x128xf32, #tpu.memory_space<vmem>>, vector<8x128xf32>
    tpu.vector_store %arg9[%c48_71, %c0_72], %229 {strides = array<i32>} : memref<64x128xf32, #tpu.memory_space<vmem>>, vector<8x128xf32>,
    %c56 = arith.constant 56 : index
    %c0_73 = arith.constant 0 : index
    %231 = vector.load %arg8[%c56, %c0_73] : memref<64x512xf32, #tpu.memory_space<vmem>>, vector<8x512xf32>
    %232 = arith.addf %231, %4 : vector<8x512xf32>
    %233 = arith.truncf %229 : vector<8x128xf32> to vector<8x128xbf16>
    %c0_74 = arith.constant 0 : index
    %c0_75 = arith.constant 0 : index
    %234 = vector.load %arg4[%c0_74, %c0_75] : memref<128x512xbf16, #tpu.memory_space<vmem>>, vector<128x512xbf16>
    %cst_76 = arith.constant dense<0.000000e+00> : vector<8x512xf32>
    %235 = tpu.matmul %233, %234, %cst_76 {dimension_numbers = #tpu.dot_dimension_numbers<[1], [0], [0], [1], [0, 0, 1, 1], [], []>} : vector<8x128xbf16>, vector<128x512xbf16>, vector<8x512xf32> -> vector<8x512xf32>
    %236 = arith.addf %232, %235 : vector<8x512xf32>
    %237 = vector.extract_strided_slice %236 {offsets = [0, 0], sizes = [8, 128], strides = [1, 1]} : vector<8x512xf32> to vector<8x128xf32>
    %238 = arith.negf %237 : vector<8x128xf32>
    %239 = math.exp %238 : vector<8x128xf32>
    %cst_77 = arith.constant 1.000000e+00 : f32
    %240 = vector.broadcast %cst_77 : f32 to vector<8x128xf32>
    %241 = arith.addf %240, %239 : vector<8x128xf32>
    %242 = arith.divf %240, %241 : vector<8x128xf32>
    %243 = vector.extract_strided_slice %236 {offsets = [0, 128], sizes = [8, 128], strides = [1, 1]} : vector<8x512xf32> to vector<8x128xf32>
    %244 = arith.negf %243 : vector<8x128xf32>
    %245 = math.exp %244 : vector<8x128xf32>
    %cst_78 = arith.constant 1.000000e+00 : f32
    %246 = vector.broadcast %cst_78 : f32 to vector<8x128xf32>
    %247 = arith.addf %246, %245 : vector<8x128xf32>
    %248 = arith.divf %246, %247 : vector<8x128xf32>
    %249 = vector.extract_strided_slice %236 {offsets = [0, 256], sizes = [8, 128], strides = [1, 1]} : vector<8x512xf32> to vector<8x128xf32>
    %250 = math.tanh %249 : vector<8x128xf32>
    %251 = vector.extract_strided_slice %236 {offsets = [0, 384], sizes = [8, 128], strides = [1, 1]} : vector<8x512xf32> to vector<8x128xf32>
    %252 = arith.negf %251 : vector<8x128xf32>
    %253 = math.exp %252 : vector<8x128xf32>
    %cst_79 = arith.constant 1.000000e+00 : f32
    %254 = vector.broadcast %cst_79 : f32 to vector<8x128xf32>
    %255 = arith.addf %254, %253 : vector<8x128xf32>
    %256 = arith.divf %254, %255 : vector<8x128xf32>
    %257 = arith.mulf %248, %227 : vector<8x128xf32>
    %258 = arith.mulf %242, %250 : vector<8x128xf32>
    %259 = arith.addf %257, %258 : vector<8x128xf32>
    %260 = math.tanh %259 : vector<8x128xf32>
    %261 = arith.mulf %256, %260 : vector<8x128xf32>
    %c56_80 = arith.constant 56 : index
    %c0_81 = arith.constant 0 : index
    %262 = vector.load %arg9[%c56_80, %c0_81] : memref<64x128xf32, #tpu.memory_space<vmem>>, vector<8x128xf32>
    tpu.vector_store %arg9[%c56_80, %c0_81], %261 {strides = array<i32>} : memref<64x128xf32, #tpu.memory_space<vmem>>, vector<8x128xf32>,
    %c0_82 = arith.constant 0 : index
    %c0_83 = arith.constant 0 : index
    %263 = vector.load %arg9[%c0_82, %c0_83] : memref<64x128xf32, #tpu.memory_space<vmem>>, vector<64x128xf32>
    %c0_84 = arith.constant 0 : index
    %c0_85 = arith.constant 0 : index
    %264 = vector.load %arg2[%c0_84, %c0_85] : memref<64x1xf32, #tpu.memory_space<vmem>>, vector<64x1xf32>
    %265 = vector.broadcast %264 : vector<64x1xf32> to vector<64x128xf32>
    %266 = arith.mulf %263, %265 : vector<64x128xf32>
    %267 = arith.truncf %266 : vector<64x128xf32> to vector<64x128xbf16>
    %c0_86 = arith.constant 0 : index
    %c0_87 = arith.constant 0 : index
    %268 = vector.load %arg5[%c0_86, %c0_87] : memref<128x128xbf16, #tpu.memory_space<vmem>>, vector<128x128xbf16>
    %cst_88 = arith.constant dense<0.000000e+00> : vector<64x128xf32>
    %269 = tpu.matmul %267, %268, %cst_88 {dimension_numbers = #tpu.dot_dimension_numbers<[1], [0], [0], [1], [0, 0, 1, 1], [], []>} : vector<64x128xbf16>, vector<128x128xbf16>, vector<64x128xf32> -> vector<64x128xf32>
    %c0_89 = arith.constant 0 : index
    %c0_90 = arith.constant 0 : index
    %270 = vector.load %arg6[%c0_89, %c0_90] : memref<1x128xf32, #tpu.memory_space<vmem>>, vector<1x128xf32>
    %271 = vector.broadcast %270 : vector<1x128xf32> to vector<64x128xf32>
    %272 = arith.addf %269, %271 : vector<64x128xf32>
    %cst_91 = arith.constant dense<0xFF800000> : vector<64xf32>
    %273 = vector.multi_reduction <maximumf>, %272, %cst_91 [1] : vector<64x128xf32> to vector<64xf32>
    %274 = vector.shape_cast %273 : vector<64xf32> to vector<64x1xf32>
    %275 = vector.broadcast %274 : vector<64x1xf32> to vector<64x128xf32>
    %276 = arith.subf %272, %275 : vector<64x128xf32>
    %277 = math.exp %276 : vector<64x128xf32>
    %cst_92 = arith.constant dense<0.000000e+00> : vector<64xf32>
    %278 = vector.multi_reduction <add>, %277, %cst_92 [1] : vector<64x128xf32> to vector<64xf32>
    %279 = vector.shape_cast %278 : vector<64xf32> to vector<64x1xf32>
    %280 = math.log %279 : vector<64x1xf32>
    %281 = vector.broadcast %280 : vector<64x1xf32> to vector<64x128xf32>
    %282 = arith.subf %276, %281 : vector<64x128xf32>
    %c0_93 = arith.constant 0 : index
    %c0_94 = arith.constant 0 : index
    %283 = vector.load %arg7[%c0_93, %c0_94] : memref<64x128xf32, #tpu.memory_space<vmem>>, vector<64x128xf32>
    tpu.vector_store %arg7[%c0_93, %c0_94], %282 {strides = array<i32>} : memref<64x128xf32, #tpu.memory_space<vmem>>, vector<64x128xf32>,
    return
  }
}

</mosaic_0001>

<bundles_post_ra>
// kernel: forward.1
= control target key start
LH: loop header
LB: loop body
LE: loop exit
PB: predicated region body
PF: predicated region fallthrough
CT: control target
= control target key end

     0   :  { %v4736_v1 = vmov 0   ;;  %vm103_vm0 = vcmask 261120   ;;  %s4728_s3 = inlined_call_operand.vmem [shape: bf16[32,512], index: 3, kind: input, shape index: {}]   ;;  %s4729_s4 = inlined_call_operand.vmem [shape: bf16[128,512], index: 4, kind: input, shape index: {}]   ;;  %s4730_s0 = inlined_call_operand.vmem [shape: bf16[64,32], index: 0, kind: input, shape index: {}]   ;;  %s4731_s2 = inlined_call_operand.vmem [shape: f32[64,1], index: 2, kind: input, shape index: {}]   ;;  %s4732_s1 = inlined_call_operand.vmem [shape: f32[8,512], index: 1, kind: input, shape index: {}]   ;;  %s4733_s5 = inlined_call_operand.vmem [shape: bf16[128,128], index: 5, kind: input, shape index: {}]   ;;  %s4734_s6 = inlined_call_operand.vmem [shape: f32[1,128], index: 6, kind: input, shape index: {}]   ;;  %s4735_s7 = inlined_call_operand.vmem [shape: f32[64,128], index: 7, kind: output, shape index: {}]  }
   0x1   :  { %v3437_v0 = vld [vmem:[%s4728_s3 + $0x4] ss:$16 sps:$4 sm:$0xff]   ;;  %148 = vmatprep.mubr.bf16.mxu1 %v4736_v1  ;;  %530 = vmatprep.mubr.bf16.mxu0 %v4736_v1  ;;  %v3441_v3 = vld [vmem:[%s4728_s3] ss:$16 sps:$4 sm:$0xff]   ;;  %v3450_v10 = vld [vmem:[%s4728_s3 + $0x8] ss:$16 sps:$4 sm:$0xff]  }
   0x2   :  { %v3790_v2 = vld [vmem:[%s4729_s4 + $0x4] ss:$16 sps:$4 sm:$0xff]   ;;  %3435 = vset.pattern.permute.xlu0 %v4736_v1  ;;  %3436 = vset.pattern.permute.xlu1 %v4736_v1  ;;  %v3800_v4 = vld [vmem:[%s4729_s4] ss:$16 sps:$4 sm:$0xff]   ;;  %v3452_v11 = vld [vmem:[%s4728_s3 + $0xc] ss:$16 sps:$4 sm:$0xff]  }
   0x3   :  { %116 = vmatprep.subr.bf16.mxu1 %v3437_v0  ;;  %498 = vmatprep.subr.bf16.mxu0 %v3790_v2  ;;  %v3443_v5 = vld [vmem:[%s4728_s3 + $0x24] ss:$16 sps:$4 sm:$0xff]   ;;  %v3447_v7 = vld [vmem:[%s4728_s3 + $0x20] ss:$16 sps:$4 sm:$0xff]   ;;  %v3459_v17 = vld [vmem:[%s4730_s0 + $0x8] sm:$0xff]  }
   0x4   :  { %117 = vmatpush1.bf16.msra.mxu1 %v3441_v3  ;;  %499 = vmatpush1.bf16.msra.mxu0 %v3800_v4  ;;  %v3810_v6 = vld [vmem:[%s4729_s4 + $0x24] ss:$16 sps:$4 sm:$0xff]   ;;  %v3818_v8 = vld [vmem:[%s4729_s4 + $0x20] ss:$16 sps:$4 sm:$0xff]   ;;  %v3469_v19 = vld [vmem:[%s4728_s3 + $0x2c] ss:$16 sps:$4 sm:$0xff]  }
   0x5   :  { %118 = vmatprep.subr.bf16.mxu1 %v3443_v5  ;;  %500 = vmatprep.subr.bf16.mxu0 %v3810_v6  ;;  %v3449_v9 = vld [vmem:[%s4730_s0] sm:$0xff]   ;;  %v3467_v21 = vld [vmem:[%s4728_s3 + $0x28] ss:$16 sps:$4 sm:$0xff]   ;;  %v3899_v24 = vld [vmem:[%s4729_s4 + $0xc] ss:$16 sps:$4 sm:$0xff]  }
   0x6   :  { %v3834_v12 = vld [vmem:[%s4729_s4 + $0x44] ss:$16 sps:$4 sm:$0xff]   ;;  %v3839_v13 = vld [vmem:[%s4729_s4 + $0x40] ss:$16 sps:$4 sm:$0xff]   ;;  %v3476_v29 = vld [vmem:[%s4730_s0 + $0x18] sm:$0xff]  }
   0x7   :  { %v3844_v14 = vld [vmem:[%s4729_s4 + $0x64] ss:$16 sps:$4 sm:$0xff]   ;;  %v3852_v15 = vld [vmem:[%s4729_s4 + $0x60] ss:$16 sps:$4 sm:$0xff]   ;;  %v3943_v31 = vld [vmem:[%s4729_s4 + $0x8] ss:$16 sps:$4 sm:$0xff]  }
   0x8   :  { %119 = vmatpush1.bf16.msra.mxu1 %v3447_v7  ;;  %501 = vmatpush1.bf16.msra.mxu0 %v3818_v8  ;;  %v3859_v16 = vld [vmem:[%s4729_s4 + $0x84] ss:$16 sps:$4 sm:$0xff]   ;;  %v3867_v18 = vld [vmem:[%s4729_s4 + $0x80] ss:$16 sps:$4 sm:$0xff]   ;;  %v3948_v32 = vld [vmem:[%s4729_s4 + $0x2c] ss:$16 sps:$4 sm:$0xff]  }
   0x9   :  { %189 = vmatprep.subr.bf16.mxu1 %v3452_v11  ;;  %502 = vmatprep.subr.bf16.mxu0 %v3834_v12  ;;  %v3877_v20 = vld [vmem:[%s4729_s4 + $0xa4] ss:$16 sps:$4 sm:$0xff]   ;;  %v3886_v22 = vld [vmem:[%s4729_s4 + $0xa0] ss:$16 sps:$4 sm:$0xff]   ;;  %v3955_v33 = vld [vmem:[%s4729_s4 + $0x28] ss:$16 sps:$4 sm:$0xff]  }
   0xa   :  { %v3893_v23 = vld [vmem:[%s4729_s4 + $0xc4] ss:$16 sps:$4 sm:$0xff]   ;;  %v3909_v26 = vld [vmem:[%s4729_s4 + $0xc0] ss:$16 sps:$4 sm:$0xff]   ;;  %v3961_v34 = vld [vmem:[%s4729_s4 + $0x4c] ss:$16 sps:$4 sm:$0xff]  }
   0xb   :  { %3101 = vmatmul.mubr.msk.bf16.vlgmr.msra.gmra.mrb[0].mxu1 %vm103_vm0, %v3449_v9  ;;  %v3466_v25 = vld [vmem:[%s4730_s0 + $0x10] sm:$0xff]   ;;  %v2801_v30 = vld [vmem:[%s4731_s2] sm:$0xff]  ;;  %v3972_v35 = vld [vmem:[%s4729_s4 + $0x48] ss:$16 sps:$4 sm:$0xff]  }
   0xc   :  { %190 = vmatpush1.bf16.msra.mxu1 %v3450_v10  ;;  %503 = vmatpush1.bf16.msra.mxu0 %v3839_v13  ;;  %v3915_v27 = vld [vmem:[%s4729_s4 + $0xe4] ss:$16 sps:$4 sm:$0xff]   ;;  %v3922_v28 = vld [vmem:[%s4729_s4 + $0xe0] ss:$16 sps:$4 sm:$0xff]   ;;  %v3978_v36 = vld [vmem:[%s4729_s4 + $0x6c] ss:$16 sps:$4 sm:$0xff]  }
   0xd   :  { %504 = vmatprep.subr.bf16.mxu0 %v3844_v14  ;;  %158 = vmatprep.mubr.bf16.mxu1 %v4736_v1  ;;  %v3987_v37 = vld [vmem:[%s4729_s4 + $0x68] ss:$16 sps:$4 sm:$0xff]   ;;  %v3994_v38 = vld [vmem:[%s4729_s4 + $0x8c] ss:$16 sps:$4 sm:$0xff]   ;;  %v294_v49 = vld [vmem:[%s4732_s1] sm:$0xff] }
   0xe   :  { %191 = vmatprep.subr.bf16.mxu1 %v3469_v19  ;;  %2811 = vperm.xlu0 %3435, %v2801_v30   ;;  %v4002_v39 = vld [vmem:[%s4729_s4 + $0x88] ss:$16 sps:$4 sm:$0xff]   ;;  %v4008_v40 = vld [vmem:[%s4729_s4 + $0xac] ss:$16 sps:$4 sm:$0xff]  }
   0xf   :  { %v4017_v41 = vld [vmem:[%s4729_s4 + $0xa8] ss:$16 sps:$4 sm:$0xff]   ;;  %v4024_v42 = vld [vmem:[%s4729_s4 + $0xcc] ss:$16 sps:$4 sm:$0xff]  }
  0x10   :  { %505 = vmatpush1.bf16.msra.mxu0 %v3852_v15  ;;  %192 = vmatpush1.bf16.msra.mxu1 %v3467_v21  ;;  %v4032_v43 = vld [vmem:[%s4729_s4 + $0xc8] ss:$16 sps:$4 sm:$0xff]   ;;  %v4038_v44 = vld [vmem:[%s4729_s4 + $0xec] ss:$16 sps:$4 sm:$0xff]  }
  0x11   :  { %506 = vmatprep.subr.bf16.mxu0 %v3859_v16  ;;  %539 = vmatprep.subr.bf16.mxu1 %v3899_v24  ;;  %v4047_v45 = vld [vmem:[%s4729_s4 + $0xe8] ss:$16 sps:$4 sm:$0xff]  }
  0x12   :  { %v2802_v46 = vld [vmem:[%s4731_s2 + $0x8] sm:$0xff] }
  0x13   :  { %3102 = vmatmul.mubr.msk.bf16.gmra.mrb[4].mxu1 %vm103_vm0, %v3459_v17  ;;  %2816 = vperm.xlu0 %3435, %v2802_v46   ;;  %v295_v51 = vld [vmem:[%s4732_s1 + $0x8] sm:$0xff] }
  0x14   :  { %507 = vmatpush1.bf16.msra.mxu0 %v3867_v18  ;;  %168 = vmatprep.mubr.bf16.mxu1 %v4736_v1 }
  0x15   :  { %508 = vmatprep.subr.bf16.mxu0 %v3877_v20 }
  0x18   :  { %509 = vmatpush1.bf16.msra.mxu0 %v3886_v22 }
  0x19   :  { %510 = vmatprep.subr.bf16.mxu0 %v3893_v23 }
  0x1b   :  { %3103 = vmatmul.mubr.msk.bf16.gmra.mrb[8].mxu1 %vm103_vm0, %v3466_v25 }
  0x1c   :  { %511 = vmatpush1.bf16.msra.mxu0 %v3909_v26  ;;  %178 = vmatprep.mubr.bf16.mxu1 %v4736_v1 }
  0x1d   :  { %512 = vmatprep.subr.bf16.mxu0 %v3915_v27 }
  0x20   :  { %513 = vmatpush1.bf16.msra.mxu0 %v3922_v28 }
  0x21   :  { %810 = vmatprep.subr.bf16.mxu0 %v3790_v2 }
  0x23   :  { %3104 = vmatmul.mubr.msk.bf16.gmra.mrb[12].mxu1 %vm103_vm0, %v3476_v29  ;;  %531 = vmatmul.mubr.bf16.vlgmr.msra.gmra.mrb[0].mxu0 %v4736_v1 }
  0x24   :  { %221 = vmatprep.mubr.bf16.mxu1 %v4736_v1  ;;  %811 = vmatpush1.bf16.msra.mxu0 %v3800_v4 }
  0x25   :  { %812 = vmatprep.subr.bf16.mxu0 %v3810_v6  ;;  %842 = vmatprep.mubr.bf16.mxu0 %v4736_v1 }
  0x28   :  { %813 = vmatpush1.bf16.msra.mxu0 %v3818_v8 }
  0x29   :  { %814 = vmatprep.subr.bf16.mxu0 %v3834_v12 }
  0x2b   :  { %3105 = vmatmul.mubr.msk.bf16.vlgmr.msra.gmra.mrb[16].mxu1 %vm103_vm0, %v3449_v9 }
  0x2c   :  { %540 = vmatpush1.bf16.msra.mxu1 %v3943_v31  ;;  %231 = vmatprep.mubr.bf16.mxu1 %v4736_v1 }
  0x2d   :  { %541 = vmatprep.subr.bf16.mxu1 %v3948_v32  ;;  %815 = vmatpush1.bf16.msra.mxu0 %v3839_v13 }
  0x2e   :  { %816 = vmatprep.subr.bf16.mxu0 %v3844_v14 }
  0x30   :  { %542 = vmatpush1.bf16.msra.mxu1 %v3955_v33 }
  0x31   :  { %543 = vmatprep.subr.bf16.mxu1 %v3961_v34  ;;  %817 = vmatpush1.bf16.msra.mxu0 %v3852_v15 }
  0x32   :  { %818 = vmatprep.subr.bf16.mxu0 %v3859_v16 }
  0x33   :  { %3106 = vmatmul.mubr.msk.bf16.gmra.mrb[20].mxu1 %vm103_vm0, %v3459_v17 }
  0x34   :  { %544 = vmatpush1.bf16.msra.mxu1 %v3972_v35  ;;  %241 = vmatprep.mubr.bf16.mxu1 %v4736_v1 }
  0x35   :  { %545 = vmatprep.subr.bf16.mxu1 %v3978_v36  ;;  %819 = vmatpush1.bf16.msra.mxu0 %v3867_v18 }
  0x36   :  { %820 = vmatprep.subr.bf16.mxu0 %v3877_v20 }
  0x38   :  { %546 = vmatpush1.bf16.msra.mxu1 %v3987_v37 }
  0x39   :  { %547 = vmatprep.subr.bf16.mxu1 %v3994_v38  ;;  %821 = vmatpush1.bf16.msra.mxu0 %v3886_v22 }
  0x3a   :  { %822 = vmatprep.subr.bf16.mxu0 %v3893_v23 }
  0x3b   :  { %3107 = vmatmul.mubr.msk.bf16.gmra.mrb[24].mxu1 %vm103_vm0, %v3466_v25 }
  0x3c   :  { %548 = vmatpush1.bf16.msra.mxu1 %v4002_v39  ;;  %251 = vmatprep.mubr.bf16.mxu1 %v4736_v1 }
  0x3d   :  { %549 = vmatprep.subr.bf16.mxu1 %v4008_v40  ;;  %823 = vmatpush1.bf16.msra.mxu0 %v3909_v26 }
  0x3e   :  { %824 = vmatprep.subr.bf16.mxu0 %v3915_v27 }
  0x40   :  { %550 = vmatpush1.bf16.msra.mxu1 %v4017_v41 }
  0x41   :  { %551 = vmatprep.subr.bf16.mxu1 %v4024_v42  ;;  %825 = vmatpush1.bf16.msra.mxu0 %v3922_v28 }
  0x42   :  { %1122 = vmatprep.subr.bf16.mxu0 %v3790_v2 }
  0x43   :  { %3108 = vmatmul.mubr.msk.bf16.gmra.mrb[28].mxu1 %vm103_vm0, %v3476_v29 }
  0x44   :  { %552 = vmatpush1.bf16.msra.mxu1 %v4032_v43  ;;  %571 = vmatprep.mubr.bf16.mxu1 %v4736_v1 }
  0x45   :  { %553 = vmatprep.subr.bf16.mxu1 %v4038_v44 }
  0x48   :  { %554 = vmatpush1.bf16.msra.mxu1 %v4047_v45 }
  0x49   :  { %851 = vmatprep.subr.bf16.mxu1 %v3899_v24 }
  0x4b   :  { %572 = vmatmul.mubr.bf16.vlgmr.msra.gmra.mrb[32].mxu1 %v4736_v1 }
  0x4c   :  { %852 = vmatpush1.bf16.msra.mxu1 %v3943_v31  ;;  %883 = vmatprep.mubr.bf16.mxu1 %v4736_v1 }
  0x4d   :  { %853 = vmatprep.subr.bf16.mxu1 %v3948_v32 }
  0x50   :  { %854 = vmatpush1.bf16.msra.mxu1 %v3955_v33 }
  0x51   :  { %855 = vmatprep.subr.bf16.mxu1 %v3961_v34 }
  0x54   :  { %856 = vmatpush1.bf16.msra.mxu1 %v3972_v35 }
  0x55   :  { %857 = vmatprep.subr.bf16.mxu1 %v3978_v36 }
  0x58   :  { %858 = vmatpush1.bf16.msra.mxu1 %v3987_v37 }
  0x59   :  { %859 = vmatprep.subr.bf16.mxu1 %v3994_v38 }
  0x5c   :  { %860 = vmatpush1.bf16.msra.mxu1 %v4002_v39 }
  0x5d   :  { %861 = vmatprep.subr.bf16.mxu1 %v4008_v40 }
  0x60   :  { %862 = vmatpush1.bf16.msra.mxu1 %v4017_v41 }
  0x61   :  { %863 = vmatprep.subr.bf16.mxu1 %v4024_v42 }
  0x64   :  { %864 = vmatpush1.bf16.msra.mxu1 %v4032_v43 }
  0x65   :  { %865 = vmatprep.subr.bf16.mxu1 %v4038_v44 }
  0x68   :  { %866 = vmatpush1.bf16.msra.mxu1 %v4047_v45 }
  0x69   :  { %1163 = vmatprep.subr.bf16.mxu1 %v3899_v24 }
  0xde   :  { %v150_v47 = vpop.f32.mrb[0].mxu1 }
  0xdf   :  { %v152_v48 = vpop.f32.mrb[1].mxu1  ;;  %v302_v11 = vadd.f32 %v294_v49, %v150_v47 }
  0xe0   :  { %v154_v50 = vpop.f32.mrb[2].mxu1  ;;  %v303_v17 = vadd.f32 %v295_v51, %v152_v48 }
  0xe1   :  { %v4080_v52 = vadd.f32 %v294_v49, %v154_v50  ;;  %v156_v53 = vpop.f32.mrb[3].mxu1 }
  0xe2   :  { %v4082_v54 = vadd.f32 %v295_v51, %v156_v53 }
  0xe6   :  { %v160_v55 = vpop.f32.mrb[4].mxu1 }
  0xe7   :  { %v4084_v56 = vadd.f32 %v294_v49, %v160_v55  ;;  %v162_v57 = vpop.f32.mrb[5].mxu1 }
  0xe8   :  { %v4086_v58 = vadd.f32 %v295_v51, %v162_v57  ;;  %v164_v59 = vpop.f32.mrb[6].mxu1 }
  0xe9   :  { %v4088_v60 = vadd.f32 %v294_v49, %v164_v59  ;;  %v166_v61 = vpop.f32.mrb[7].mxu1 }
  0xea   :  { %v4090_v62 = vadd.f32 %v295_v51, %v166_v61 }
  0xee   :  { %v170_v63 = vpop.f32.mrb[8].mxu1 }
  0xef   :  { %v4092_v0 = vadd.f32 %v294_v49, %v170_v63  ;;  %v172_v2 = vpop.f32.mrb[9].mxu1 }
  0xf0   :  { %v4094_v3 = vadd.f32 %v295_v51, %v172_v2  ;;  %v174_v5 = vpop.f32.mrb[10].mxu1 }
  0xf1   :  { %4738 = vst [vmem:[#allocation4_spill] sm:$0xff] %v4092_v0  ;;  %v4096_v7 = vadd.f32 %v294_v49, %v174_v5  ;;  %v176_v9 = vpop.f32.mrb[11].mxu1  ;;  %v296_v5 = vld [vmem:[%s4732_s1 + $0x10] sm:$0xff] }
  0xf2   :  { %4739 = vst [vmem:[#allocation5_spill] sm:$0xff] %v4094_v3  ;;  %v4098_v10 = vadd.f32 %v295_v51, %v176_v9 }
  0xf3   :  { %4740 = vst [vmem:[#allocation6_spill] sm:$0xff] %v4096_v7 }
  0xf4   :  { %4741 = vst [vmem:[#allocation7_spill] sm:$0xff] %v4098_v10 }
  0xf6   :  { %v180_v19 = vpop.f32.mrb[12].mxu1  ;;  %v532_v21 = vpop.f32.mrb[0].mxu0 }
  0xf7   :  { %v4100_v25 = vadd.f32 %v294_v49, %v180_v19  ;;  %v580_v29 = vadd.f32 %v532_v21, %v302_v11  ;;  %v182_v30 = vpop.f32.mrb[13].mxu1  ;;  %v534_v46 = vpop.f32.mrb[1].mxu0  ;;  %v297_v11 = vld [vmem:[%s4732_s1 + $0x18] sm:$0xff] }
  0xf8   :  { %v4102_v50 = vadd.f32 %v295_v51, %v182_v30  ;;  %v581_v53 = vadd.f32 %v534_v46, %v303_v17  ;;  %v184_v55 = vpop.f32.mrb[14].mxu1  ;;  %v536_v57 = vpop.f32.mrb[2].mxu0 }
  0xf9   :  { %4742 = vst [vmem:[#allocation8_spill] sm:$0xff] %v4100_v25  ;;  %v4104_v59 = vadd.f32 %v294_v49, %v184_v55  ;;  %v186_v61 = vpop.f32.mrb[15].mxu1  ;;  %v537_v63 = vpop.f32.mrb[3].mxu0 }
  0xfa   :  { %4743 = vst [vmem:[#allocation9_spill] sm:$0xff] %v4102_v50  ;;  %v4106_v2 = vadd.f32 %v295_v51, %v186_v61  ;;  %v3142_v63 = vmul.f32 -1.442695, %v581_v53 }
  0xfb   :  { %4744 = vst [vmem:[#allocation10_spill] sm:$0xff] %v4104_v59 }
  0xfc   :  { %4745 = vst [vmem:[#allocation11_spill] sm:$0xff] %v4106_v2  ;;  %v3141_v2 = vmul.f32 -1.442695, %v580_v29  ;;  %3581 = vpow2.f32 %v3142_v63 }
  0xfe   :  { %v223_v47 = vpop.f32.mrb[16].mxu1  ;;  %3583 = vpow2.f32 %v3141_v2 }
  0xff   :  { %v225_v48 = vpop.f32.mrb[17].mxu1 }
 0x100   :  { %v227_v9 = vpop.f32.mrb[18].mxu1 }
 0x101   :  { %v4114_v17 = vadd.f32 %v296_v5, %v227_v9  ;;  %v229_v19 = vpop.f32.mrb[19].mxu1 }
 0x102   :  { %v4116_v49 = vadd.f32 %v297_v11, %v229_v19 }
 0x106   :  { %v233_v21 = vpop.f32.mrb[20].mxu1 }
 0x107   :  { %v4118_v30 = vadd.f32 %v296_v5, %v233_v21  ;;  %v235_v51 = vpop.f32.mrb[21].mxu1 }
 0x108   :  { %v4120_v46 = vadd.f32 %v297_v11, %v235_v51  ;;  %v237_v55 = vpop.f32.mrb[22].mxu1 }
 0x109   :  { %v4122_v57 = vadd.f32 %v296_v5, %v237_v55  ;;  %v239_v61 = vpop.f32.mrb[23].mxu1 }
 0x10a   :  { %v4124_v1 = vadd.f32 %v297_v11, %v239_v61  ;;  %v3582_v61 = vpop.eup %3581 }
 0x10b   :  { %v3584_v2 = vpop.eup %3583 }
 0x10c   :  { %4746 = vst [vmem:[#allocation12_spill] sm:$0xff] %v4124_v1 }
 0x10e   :  { %v243_v9 = vpop.f32.mrb[24].mxu1 }
 0x10f   :  { %v4126_v59 = vadd.f32 %v296_v5, %v243_v9  ;;  %v245_v19 = vpop.f32.mrb[25].mxu1 }
 0x110   :  { %v4128_v50 = vadd.f32 %v297_v11, %v245_v19  ;;  %v247_v21 = vpop.f32.mrb[26].mxu1 }
 0x111   :  { %4747 = vst [vmem:[#allocation13_spill] sm:$0xff] %v4126_v59  ;;  %v4130_v25 = vadd.f32 %v296_v5, %v247_v21  ;;  %v249_v51 = vpop.f32.mrb[27].mxu1  ;;  %v587_v21 = vadd.f32 1.0, %v3584_v2  ;;  %v305_v59 = vadd.f32 %v297_v11, %v225_v48 }
 0x112   :  { %4748 = vst [vmem:[#allocation14_spill] sm:$0xff] %v4128_v50  ;;  %v4132_v10 = vadd.f32 %v297_v11, %v249_v51  ;;  %v593_v50 = vadd.f32 1.0, %v3582_v61 }
 0x113   :  { %4749 = vst [vmem:[#allocation15_spill] sm:$0xff] %v4130_v25  ;;  %v304_v25 = vadd.f32 %v296_v5, %v223_v47 }
 0x114   :  { %4750 = vst [vmem:[#allocation16_spill] sm:$0xff] %v4132_v10  ;;  %3585 = vrcp.f32 %v593_v50 }
 0x115   :  { %3587 = vrcp.f32 %v587_v21  ;;  %v2812_v21 = vpop.permute.xlu0 %2811 }
 0x116   :  { %v253_v55 = vpop.f32.mrb[28].mxu1 }
 0x117   :  { %v4134_v7 = vadd.f32 %v296_v5, %v253_v55  ;;  %v255_v53 = vpop.f32.mrb[29].mxu1 }
 0x118   :  { %v4136_v29 = vadd.f32 %v297_v11, %v255_v53  ;;  %v257_v63 = vpop.f32.mrb[30].mxu1 }
 0x119   :  { %4751 = vst [vmem:[#allocation17_spill] sm:$0xff] %v4134_v7  ;;  %v4138_v9 = vadd.f32 %v296_v5, %v257_v63  ;;  %v259_v3 = vpop.f32.mrb[31].mxu1 }
 0x11a   :  { %4752 = vst [vmem:[#allocation18_spill] sm:$0xff] %v4136_v29  ;;  %v4140_v19 = vadd.f32 %v297_v11, %v259_v3 }
 0x11b   :  { %4753 = vst [vmem:[#allocation19_spill] sm:$0xff] %v4138_v9 }
 0x11c   :  { %4754 = vst [vmem:[#allocation20_spill] sm:$0xff] %v4140_v19 }
 0x11e   :  { %v573_v51 = vpop.f32.mrb[32].mxu1  ;;  %v3586_v63 = vpop.eup %3585 }
 0x11f   :  { %v582_v10 = vadd.f32 %v573_v51, %v304_v25  ;;  %v575_v55 = vpop.f32.mrb[33].mxu1  ;;  %v3588_v9 = vpop.eup %3587  ;;  %v603_v3 = vmul.f32 0.0, %v3586_v63 }
 0x120   :  { %v583_v7 = vadd.f32 %v575_v55, %v305_v59  ;;  %v577_v0 = vpop.f32.mrb[34].mxu1 }
 0x121   :  { %3589 = vtanh.f32 %v582_v10  ;;  %v578_v53 = vpop.f32.mrb[35].mxu1 }
 0x122   :  { %v3143_v29 = vmul.f32 -1.442695, %v583_v7  ;;  %v2817_v53 = vpop.permute.xlu0 %2816 }
 0x124   :  { %3591 = vpow2.f32 %v3143_v29 }
 0x12b   :  { %v3590_v1 = vpop.eup %3589 }
 0x12c   :  { %v604_v19 = vmul.f32 %v3590_v1, %v3588_v9  ;;  %v4755_v1 = vmov 0  }
 0x12e   :  { %v3592_v61 = vpop.eup %3591  ;;  %v4142_v2 = vadd.f32 %v604_v19, %v603_v3 }
 0x12f   :  { %v600_v47 = vadd.f32 1.0, %v3592_v61 }
 0x130   :  { %3593 = vtanh.f32 %v4142_v2 }
 0x131   :  { %3595 = vrcp.f32 %v600_v47 }
 0x13a   :  { %v3594_v25 = vpop.eup %3593 }
 0x13b   :  { %v3596_v50 = vpop.eup %3595 }
 0x13c   :  { %v4145_v59 = vmul.f32 %v3596_v50, %v3594_v25  ;;  %v2804_v50 = vld [vmem:[%s4731_s2 + $0x18] sm:$0xff] }
 0x13e   :  { %v617_v0 = vpack.c.bf16 %v4145_v59, %v4145_v59  ;;  %v4194_v3 = vmul.f32 %v2812_v21, %v4145_v59  ;;  %v4367_v21 = vld [vmem:[%s4729_s4 + $0x28] ss:$16 sps:$4 sm:$0xff]  }
 0x140   :  { %843 = vmatmul.mubr.bf16.vlgmr.msra.gmra.mrb[4].mxu0 %v617_v0  ;;  %884 = vmatmul.mubr.bf16.vlgmr.msra.gmra.mrb[36].mxu1 %v617_v0 }
 0x141   :  { %1123 = vmatpush1.bf16.msra.mxu0 %v3800_v4  ;;  %1164 = vmatpush1.bf16.msra.mxu1 %v3943_v31  ;;  %v2803_v4 = vld [vmem:[%s4731_s2 + $0x10] sm:$0xff] }
 0x142   :  { %1124 = vmatprep.subr.bf16.mxu0 %v3810_v6  ;;  %1165 = vmatprep.subr.bf16.mxu1 %v3948_v32 }
 0x143   :  { %1154 = vmatprep.mubr.bf16.mxu0 %v4755_v1  ;;  %1195 = vmatprep.mubr.bf16.mxu1 %v4755_v1 }
 0x144   :  { %2821 = vperm.xlu1 %3436, %v2803_v4  }
 0x145   :  { %1125 = vmatpush1.bf16.msra.mxu0 %v3818_v8  ;;  %1166 = vmatpush1.bf16.msra.mxu1 %v3955_v33 }
 0x146   :  { %1126 = vmatprep.subr.bf16.mxu0 %v3834_v12  ;;  %1167 = vmatprep.subr.bf16.mxu1 %v3961_v34 }
 0x148   :  { %2826 = vperm.xlu1 %3436, %v2804_v50   ;;  %v4403_v50 = vld [vmem:[%s4729_s4 + $0x88] ss:$16 sps:$4 sm:$0xff]  }
 0x149   :  { %1127 = vmatpush1.bf16.msra.mxu0 %v3839_v13  ;;  %1168 = vmatpush1.bf16.msra.mxu1 %v3972_v35 }
 0x14a   :  { %1128 = vmatprep.subr.bf16.mxu0 %v3844_v14  ;;  %1169 = vmatprep.subr.bf16.mxu1 %v3978_v36 }
 0x14d   :  { %1129 = vmatpush1.bf16.msra.mxu0 %v3852_v15  ;;  %1170 = vmatpush1.bf16.msra.mxu1 %v3987_v37 }
 0x14e   :  { %1130 = vmatprep.subr.bf16.mxu0 %v3859_v16  ;;  %1171 = vmatprep.subr.bf16.mxu1 %v3994_v38 }
 0x151   :  { %1131 = vmatpush1.bf16.msra.mxu0 %v3867_v18  ;;  %1172 = vmatpush1.bf16.msra.mxu1 %v4002_v39 }
 0x152   :  { %1132 = vmatprep.subr.bf16.mxu0 %v3877_v20  ;;  %1173 = vmatprep.subr.bf16.mxu1 %v4008_v40 }
 0x155   :  { %1133 = vmatpush1.bf16.msra.mxu0 %v3886_v22  ;;  %1174 = vmatpush1.bf16.msra.mxu1 %v4017_v41 }
 0x156   :  { %1134 = vmatprep.subr.bf16.mxu0 %v3893_v23  ;;  %1175 = vmatprep.subr.bf16.mxu1 %v4024_v42 }
 0x159   :  { %1135 = vmatpush1.bf16.msra.mxu0 %v3909_v26  ;;  %1176 = vmatpush1.bf16.msra.mxu1 %v4032_v43 }
 0x15a   :  { %1136 = vmatprep.subr.bf16.mxu0 %v3915_v27  ;;  %1177 = vmatprep.subr.bf16.mxu1 %v4038_v44 }
 0x15d   :  { %1137 = vmatpush1.bf16.msra.mxu0 %v3922_v28  ;;  %1178 = vmatpush1.bf16.msra.mxu1 %v4047_v45 }
 0x15e   :  { %1475 = vmatprep.subr.bf16.mxu1 %v3899_v24 }
 0x213   :  { %v844_v6 = vpop.f32.mrb[4].mxu0  ;;  %v885_v8 = vpop.f32.mrb[36].mxu1 }
 0x214   :  { %v892_v12 = vadd.f32 %v844_v6, %v4080_v52  ;;  %v894_v13 = vadd.f32 %v885_v8, %v4114_v17  ;;  %v846_v14 = vpop.f32.mrb[5].mxu0  ;;  %v887_v15 = vpop.f32.mrb[37].mxu1 }
 0x215   :  { %v893_v16 = vadd.f32 %v846_v14, %v4082_v54  ;;  %v895_v18 = vadd.f32 %v887_v15, %v4116_v49  ;;  %v848_v20 = vpop.f32.mrb[6].mxu0  ;;  %v889_v22 = vpop.f32.mrb[38].mxu1 }
 0x216   :  { %v3176_v23 = vmul.f32 -1.442695, %v892_v12  ;;  %v849_v24 = vpop.f32.mrb[7].mxu0  ;;  %v890_v26 = vpop.f32.mrb[39].mxu1 }
 0x217   :  { %v3177_v27 = vmul.f32 -1.442695, %v893_v16  ;;  %v3178_v28 = vmul.f32 -1.442695, %v895_v18 }
 0x218   :  { %3597 = vpow2.f32 %v3176_v23 }
 0x219   :  { %3599 = vpow2.f32 %v3177_v27 }
 0x21a   :  { %3601 = vpow2.f32 %v3178_v28 }
 0x21b   :  { %3603 = vtanh.f32 %v894_v13 }
 0x222   :  { %v3598_v7 = vpop.eup %3597 }
 0x223   :  { %v3600_v10 = vpop.eup %3599  ;;  %v899_v52 = vadd.f32 1.0, %v3598_v7 }
 0x224   :  { %v905_v48 = vadd.f32 1.0, %v3600_v10  ;;  %v3602_v54 = vpop.eup %3601 }
 0x225   :  { %3605 = vrcp.f32 %v899_v52  ;;  %v3604_v5 = vpop.eup %3603  ;;  %v912_v29 = vadd.f32 1.0, %v3602_v54 }
 0x226   :  { %3607 = vrcp.f32 %v905_v48 }
 0x227   :  { %3609 = vrcp.f32 %v912_v29  ;;  %v4350_v29 = vld [vmem:[%s4729_s4 + $0xc] ss:$16 sps:$4 sm:$0xff]  }
 0x22f   :  { %v3606_v11 = vpop.eup %3605 }
 0x230   :  { %v3608_v17 = vpop.eup %3607  ;;  %v916_v49 = vmul.f32 %v3606_v11, %v3604_v5 }
 0x231   :  { %v915_v9 = vmul.f32 %v3608_v17, %v4142_v2  ;;  %v3610_v51 = vpop.eup %3609  ;;  %v4309_v2 = vld [vmem:[%s4729_s4 + $0xe0] ss:$16 sps:$4 sm:$0xff]  }
 0x233   :  { %v4190_v19 = vadd.f32 %v916_v49, %v915_v9  ;;  %v4355_v9 = vld [vmem:[%s4729_s4 + $0x8] ss:$16 sps:$4 sm:$0xff]  }
 0x235   :  { %3611 = vtanh.f32 %v4190_v19 }
 0x23f   :  { %v3612_v55 = vpop.eup %3611 }
 0x240   :  { %v919_v63 = vmul.f32 %v3612_v55, %v3610_v51  ;;  %v4374_v51 = vld [vmem:[%s4729_s4 + $0x4c] ss:$16 sps:$4 sm:$0xff]   ;;  %v4379_v55 = vld [vmem:[%s4729_s4 + $0x48] ss:$16 sps:$4 sm:$0xff]  }
 0x242   :  { %v929_v61 = vpack.c.bf16 %v919_v63, %v919_v63  ;;  %v4196_v47 = vmul.f32 %v2817_v53, %v919_v63  ;;  %v4386_v53 = vld [vmem:[%s4729_s4 + $0x6c] ss:$16 sps:$4 sm:$0xff]   ;;  %v4391_v63 = vld [vmem:[%s4729_s4 + $0x68] ss:$16 sps:$4 sm:$0xff]  }
 0x244   :  { %v2857_v25 = vpack.c.bf16 %v4196_v47, %v4194_v3  ;;  %1155 = vmatmul.mubr.bf16.vlgmr.msra.gmra.mrb[8].mxu0 %v929_v61  ;;  %1196 = vmatmul.mubr.bf16.vlgmr.msra.gmra.mrb[40].mxu1 %v929_v61  ;;  %v4397_v61 = vld [vmem:[%s4729_s4 + $0x8c] ss:$16 sps:$4 sm:$0xff]   ;;  %v3579_v47 = vld [vmem:[%s4733_s5 + $0x30] sm:$0xff]  }
 0x245   :  { %1476 = vmatpush1.bf16.msra.mxu1 %v3943_v31  ;;  %1466 = vmatprep.mubr.bf16.mxu0 %v4755_v1  ;;  %v4220_v31 = vld [vmem:[%s4729_s4 + $0x4] ss:$16 sps:$4 sm:$0xff]   ;;  %v3578_v3 = vld [vmem:[%s4733_s5 + $0x28] sm:$0xff]  }
 0x246   :  { %1477 = vmatprep.subr.bf16.mxu1 %v3948_v32  ;;  %1507 = vmatprep.mubr.bf16.mxu1 %v4755_v1  ;;  %v4225_v32 = vld [vmem:[%s4729_s4] ss:$16 sps:$4 sm:$0xff]  }
 0x247   :  { %1434 = vmatprep.subr.bf16.mxu0 %v4220_v31 }
 0x248   :  { %1435 = vmatpush1.bf16.msra.mxu0 %v4225_v32 }
 0x249   :  { %1478 = vmatpush1.bf16.msra.mxu1 %v3955_v33  ;;  %v4232_v33 = vld [vmem:[%s4729_s4 + $0x24] ss:$16 sps:$4 sm:$0xff]  }
 0x24a   :  { %1479 = vmatprep.subr.bf16.mxu1 %v3961_v34  ;;  %v4237_v34 = vld [vmem:[%s4729_s4 + $0x20] ss:$16 sps:$4 sm:$0xff]   ;;  %1436 = vmatprep.subr.bf16.mxu0 %v4232_v33 }
 0x24c   :  { %1437 = vmatpush1.bf16.msra.mxu0 %v4237_v34 }
 0x24d   :  { %1480 = vmatpush1.bf16.msra.mxu1 %v3972_v35  ;;  %v4244_v35 = vld [vmem:[%s4729_s4 + $0x44] ss:$16 sps:$4 sm:$0xff]  }
 0x24e   :  { %1481 = vmatprep.subr.bf16.mxu1 %v3978_v36  ;;  %v4249_v36 = vld [vmem:[%s4729_s4 + $0x40] ss:$16 sps:$4 sm:$0xff]   ;;  %1438 = vmatprep.subr.bf16.mxu0 %v4244_v35 }
 0x250   :  { %1439 = vmatpush1.bf16.msra.mxu0 %v4249_v36 }
 0x251   :  { %1482 = vmatpush1.bf16.msra.mxu1 %v3987_v37  ;;  %v4256_v37 = vld [vmem:[%s4729_s4 + $0x64] ss:$16 sps:$4 sm:$0xff]  }
 0x252   :  { %1483 = vmatprep.subr.bf16.mxu1 %v3994_v38  ;;  %v4261_v38 = vld [vmem:[%s4729_s4 + $0x60] ss:$16 sps:$4 sm:$0xff]   ;;  %1440 = vmatprep.subr.bf16.mxu0 %v4256_v37 }
 0x254   :  { %1441 = vmatpush1.bf16.msra.mxu0 %v4261_v38 }
 0x255   :  { %1484 = vmatpush1.bf16.msra.mxu1 %v4002_v39  ;;  %v4267_v39 = vld [vmem:[%s4729_s4 + $0x84] ss:$16 sps:$4 sm:$0xff]  }
 0x256   :  { %1485 = vmatprep.subr.bf16.mxu1 %v4008_v40  ;;  %v4273_v40 = vld [vmem:[%s4729_s4 + $0x80] ss:$16 sps:$4 sm:$0xff]   ;;  %1442 = vmatprep.subr.bf16.mxu0 %v4267_v39 }
 0x258   :  { %1443 = vmatpush1.bf16.msra.mxu0 %v4273_v40 }
 0x259   :  { %1486 = vmatpush1.bf16.msra.mxu1 %v4017_v41  ;;  %v4279_v41 = vld [vmem:[%s4729_s4 + $0xa4] ss:$16 sps:$4 sm:$0xff]  }
 0x25a   :  { %1487 = vmatprep.subr.bf16.mxu1 %v4024_v42  ;;  %v4285_v42 = vld [vmem:[%s4729_s4 + $0xa0] ss:$16 sps:$4 sm:$0xff]   ;;  %1444 = vmatprep.subr.bf16.mxu0 %v4279_v41 }
 0x25c   :  { %1445 = vmatpush1.bf16.msra.mxu0 %v4285_v42 }
 0x25d   :  { %1488 = vmatpush1.bf16.msra.mxu1 %v4032_v43  ;;  %v4291_v43 = vld [vmem:[%s4729_s4 + $0xc4] ss:$16 sps:$4 sm:$0xff]  }
 0x25e   :  { %1489 = vmatprep.subr.bf16.mxu1 %v4038_v44  ;;  %v4297_v44 = vld [vmem:[%s4729_s4 + $0xc0] ss:$16 sps:$4 sm:$0xff]   ;;  %1446 = vmatprep.subr.bf16.mxu0 %v4291_v43 }
 0x260   :  { %1447 = vmatpush1.bf16.msra.mxu0 %v4297_v44 }
 0x261   :  { %1490 = vmatpush1.bf16.msra.mxu1 %v4047_v45  ;;  %v4303_v45 = vld [vmem:[%s4729_s4 + $0xe4] ss:$16 sps:$4 sm:$0xff]  }
 0x262   :  { %1448 = vmatprep.subr.bf16.mxu0 %v4303_v45  ;;  %1787 = vmatprep.subr.bf16.mxu1 %v4350_v29 }
 0x264   :  { %1449 = vmatpush1.bf16.msra.mxu0 %v4309_v2 }
 0x265   :  { %1746 = vmatprep.subr.bf16.mxu0 %v4220_v31 }
 0x317   :  { %v1156_v59 = vpop.f32.mrb[8].mxu0  ;;  %v1197_v0 = vpop.f32.mrb[40].mxu1 }
 0x318   :  { %v1204_v4 = vadd.f32 %v1156_v59, %v4084_v56  ;;  %v1206_v6 = vadd.f32 %v1197_v0, %v4118_v30  ;;  %v1158_v8 = vpop.f32.mrb[9].mxu0  ;;  %v1199_v12 = vpop.f32.mrb[41].mxu1  ;;  %v4409_v59 = vld [vmem:[%s4729_s4 + $0xac] ss:$16 sps:$4 sm:$0xff]   ;;  %v4415_v0 = vld [vmem:[%s4729_s4 + $0xa8] ss:$16 sps:$4 sm:$0xff]  }
 0x319   :  { %v1205_v13 = vadd.f32 %v1158_v8, %v4086_v58  ;;  %v1207_v14 = vadd.f32 %v1199_v12, %v4120_v46  ;;  %v1160_v15 = vpop.f32.mrb[10].mxu0  ;;  %v1201_v16 = vpop.f32.mrb[42].mxu1  ;;  %v4433_v8 = vld [vmem:[%s4729_s4 + $0xec] ss:$16 sps:$4 sm:$0xff]   ;;  %v4439_v12 = vld [vmem:[%s4729_s4 + $0xe8] ss:$16 sps:$4 sm:$0xff]  }
 0x31a   :  { %v3211_v18 = vmul.f32 -1.442695, %v1204_v4  ;;  %v1161_v20 = vpop.f32.mrb[11].mxu0  ;;  %v1202_v22 = vpop.f32.mrb[43].mxu1  ;;  %v4421_v4 = vld [vmem:[%s4729_s4 + $0xcc] ss:$16 sps:$4 sm:$0xff]  }
 0x31b   :  { %v3212_v23 = vmul.f32 -1.442695, %v1205_v13  ;;  %v3213_v24 = vmul.f32 -1.442695, %v1207_v14  ;;  %v2805_v13 = vld [vmem:[%s4731_s2 + $0x20] sm:$0xff] }
 0x31c   :  { %3613 = vpow2.f32 %v3211_v18  ;;  %2831 = vperm.xlu0 %3435, %v2805_v13  }
 0x31d   :  { %3615 = vpow2.f32 %v3212_v23 }
 0x31e   :  { %3617 = vpow2.f32 %v3213_v24  ;;  %v4756_v24 = vld [vmem:[#allocation12_spill] sm:$0xff] }
 0x31f   :  { %3619 = vtanh.f32 %v1206_v6  ;;  %v4427_v6 = vld [vmem:[%s4729_s4 + $0xc8] ss:$16 sps:$4 sm:$0xff]  }
 0x326   :  { %v3614_v26 = vpop.eup %3613 }
 0x327   :  { %v3616_v27 = vpop.eup %3615  ;;  %v1211_v56 = vadd.f32 1.0, %v3614_v26 }
 0x328   :  { %v1217_v30 = vadd.f32 1.0, %v3616_v27  ;;  %v3618_v58 = vpop.eup %3617 }
 0x329   :  { %3621 = vrcp.f32 %v1211_v56  ;;  %v3620_v28 = vpop.eup %3619  ;;  %v1224_v52 = vadd.f32 1.0, %v3618_v58 }
 0x32a   :  { %3623 = vrcp.f32 %v1217_v30 }
 0x32b   :  { %3625 = vrcp.f32 %v1224_v52 }
 0x333   :  { %v3622_v46 = vpop.eup %3621 }
 0x334   :  { %v3624_v7 = vpop.eup %3623  ;;  %v1228_v10 = vmul.f32 %v3622_v46, %v3620_v28 }
 0x335   :  { %v1227_v48 = vmul.f32 %v3624_v7, %v4190_v19  ;;  %v3626_v5 = vpop.eup %3625  ;;  %v4362_v19 = vld [vmem:[%s4729_s4 + $0x2c] ss:$16 sps:$4 sm:$0xff]  }
 0x337   :  { %v4322_v54 = vadd.f32 %v1228_v10, %v1227_v48 }
 0x339   :  { %3627 = vtanh.f32 %v4322_v54 }
 0x343   :  { %v3628_v11 = vpop.eup %3627 }
 0x344   :  { %v4325_v17 = vmul.f32 %v3628_v11, %v3626_v5 }
 0x346   :  { %v1241_v49 = vpack.c.bf16 %v4325_v17, %v4325_v17 }
 0x348   :  { %1467 = vmatmul.mubr.bf16.vlgmr.msra.gmra.mrb[12].mxu0 %v1241_v49  ;;  %1508 = vmatmul.mubr.bf16.vlgmr.msra.gmra.mrb[44].mxu1 %v1241_v49 }
 0x349   :  { %1747 = vmatpush1.bf16.msra.mxu0 %v4225_v32  ;;  %1778 = vmatprep.mubr.bf16.mxu0 %v4755_v1 }
 0x34a   :  { %1748 = vmatprep.subr.bf16.mxu0 %v4232_v33  ;;  %1819 = vmatprep.mubr.bf16.mxu1 %v4755_v1 }
 0x34b   :  { %1788 = vmatpush1.bf16.msra.mxu1 %v4355_v9 }
 0x34c   :  { %1789 = vmatprep.subr.bf16.mxu1 %v4362_v19 }
 0x34d   :  { %1749 = vmatpush1.bf16.msra.mxu0 %v4237_v34 }
 0x34e   :  { %1750 = vmatprep.subr.bf16.mxu0 %v4244_v35 }
 0x34f   :  { %1790 = vmatpush1.bf16.msra.mxu1 %v4367_v21 }
 0x350   :  { %1791 = vmatprep.subr.bf16.mxu1 %v4374_v51 }
 0x351   :  { %1751 = vmatpush1.bf16.msra.mxu0 %v4249_v36 }
 0x352   :  { %1752 = vmatprep.subr.bf16.mxu0 %v4256_v37 }
 0x353   :  { %1792 = vmatpush1.bf16.msra.mxu1 %v4379_v55 }
 0x354   :  { %1793 = vmatprep.subr.bf16.mxu1 %v4386_v53 }
 0x355   :  { %1753 = vmatpush1.bf16.msra.mxu0 %v4261_v38 }
 0x356   :  { %1754 = vmatprep.subr.bf16.mxu0 %v4267_v39 }
 0x357   :  { %1794 = vmatpush1.bf16.msra.mxu1 %v4391_v63 }
 0x358   :  { %1795 = vmatprep.subr.bf16.mxu1 %v4397_v61 }
 0x359   :  { %1755 = vmatpush1.bf16.msra.mxu0 %v4273_v40 }
 0x35a   :  { %1756 = vmatprep.subr.bf16.mxu0 %v4279_v41 }
 0x35b   :  { %1796 = vmatpush1.bf16.msra.mxu1 %v4403_v50 }
 0x35c   :  { %1797 = vmatprep.subr.bf16.mxu1 %v4409_v59 }
 0x35d   :  { %1757 = vmatpush1.bf16.msra.mxu0 %v4285_v42 }
 0x35e   :  { %1758 = vmatprep.subr.bf16.mxu0 %v4291_v43 }
 0x35f   :  { %1798 = vmatpush1.bf16.msra.mxu1 %v4415_v0 }
 0x360   :  { %1799 = vmatprep.subr.bf16.mxu1 %v4421_v4 }
 0x361   :  { %1759 = vmatpush1.bf16.msra.mxu0 %v4297_v44 }
 0x362   :  { %1760 = vmatprep.subr.bf16.mxu0 %v4303_v45 }
 0x363   :  { %1800 = vmatpush1.bf16.msra.mxu1 %v4427_v6 }
 0x364   :  { %1801 = vmatprep.subr.bf16.mxu1 %v4433_v8 }
 0x365   :  { %1761 = vmatpush1.bf16.msra.mxu0 %v4309_v2 }
 0x366   :  { %2058 = vmatprep.subr.bf16.mxu0 %v4220_v31 }
 0x367   :  { %1802 = vmatpush1.bf16.msra.mxu1 %v4439_v12 }
 0x368   :  { %2099 = vmatprep.subr.bf16.mxu1 %v4350_v29 }
 0x41b   :  { %v1468_v14 = vpop.f32.mrb[12].mxu0  ;;  %v1509_v15 = vpop.f32.mrb[44].mxu1 }
 0x41c   :  { %v1516_v16 = vadd.f32 %v1468_v14, %v4088_v60  ;;  %v1518_v18 = vadd.f32 %v1509_v15, %v4122_v57  ;;  %v1470_v20 = vpop.f32.mrb[13].mxu0  ;;  %v1511_v22 = vpop.f32.mrb[45].mxu1 }
 0x41d   :  { %v1517_v23 = vadd.f32 %v1470_v20, %v4090_v62  ;;  %v1519_v26 = vadd.f32 %v1511_v22, %v4756_v24  ;;  %v1472_v27 = vpop.f32.mrb[14].mxu0  ;;  %v1513_v56 = vpop.f32.mrb[46].mxu1 }
 0x41e   :  { %v3246_v30 = vmul.f32 -1.442695, %v1516_v16  ;;  %v1473_v58 = vpop.f32.mrb[15].mxu0  ;;  %v1514_v28 = vpop.f32.mrb[47].mxu1 }
 0x41f   :  { %v3247_v46 = vmul.f32 -1.442695, %v1517_v23  ;;  %v3248_v7 = vmul.f32 -1.442695, %v1519_v26  ;;  %v2822_v16 = vpop.permute.xlu1 %2821  ;;  %v4757_v58 = vld [vmem:[#allocation4_spill] sm:$0xff] }
 0x420   :  { %3629 = vpow2.f32 %v3246_v30  ;;  %v4456_v24 = vmul.f32 %v2822_v16, %v4325_v17 }
 0x421   :  { %3631 = vpow2.f32 %v3247_v46  ;;  %v4758_v46 = vld [vmem:[#allocation13_spill] sm:$0xff] }
 0x422   :  { %3633 = vpow2.f32 %v3248_v7 }
 0x423   :  { %3635 = vtanh.f32 %v1518_v18  ;;  %v2827_v18 = vpop.permute.xlu1 %2826 }
 0x42a   :  { %v3630_v10 = vpop.eup %3629 }
 0x42b   :  { %v3632_v52 = vpop.eup %3631  ;;  %v1523_v60 = vadd.f32 1.0, %v3630_v10 }
 0x42c   :  { %v1529_v57 = vadd.f32 1.0, %v3632_v52  ;;  %v3634_v62 = vpop.eup %3633 }
 0x42d   :  { %3637 = vrcp.f32 %v1523_v60  ;;  %v3636_v48 = vpop.eup %3635  ;;  %v1536_v13 = vadd.f32 1.0, %v3634_v62  ;;  %v4759_v60 = vld [vmem:[#allocation5_spill] sm:$0xff]  ;;  %v4760_v62 = vld [vmem:[#allocation14_spill] sm:$0xff] }
 0x42e   :  { %3639 = vrcp.f32 %v1529_v57 }
 0x42f   :  { %3641 = vrcp.f32 %v1536_v13 }
 0x437   :  { %v3638_v5 = vpop.eup %3637 }
 0x438   :  { %v3640_v11 = vpop.eup %3639  ;;  %v1540_v49 = vmul.f32 %v3638_v5, %v3636_v48 }
 0x439   :  { %v1539_v14 = vmul.f32 %v3640_v11, %v4322_v54  ;;  %v3642_v20 = vpop.eup %3641  ;;  %v2806_v54 = vld [vmem:[%s4731_s2 + $0x28] sm:$0xff] }
 0x43a   :  { %2836 = vperm.xlu1 %3436, %v2806_v54  }
 0x43b   :  { %v4452_v15 = vadd.f32 %v1540_v49, %v1539_v14 }
 0x43d   :  { %3643 = vtanh.f32 %v4452_v15 }
 0x447   :  { %v3644_v22 = vpop.eup %3643 }
 0x448   :  { %v1543_v23 = vmul.f32 %v3644_v22, %v3642_v20 }
 0x44a   :  { %v1553_v26 = vpack.c.bf16 %v1543_v23, %v1543_v23  ;;  %v4458_v27 = vmul.f32 %v2827_v18, %v1543_v23 }
 0x44c   :  { %v2858_v56 = vpack.c.bf16 %v4458_v27, %v4456_v24  ;;  %1779 = vmatmul.mubr.bf16.vlgmr.msra.gmra.mrb[16].mxu0 %v1553_v26  ;;  %1820 = vmatmul.mubr.bf16.vlgmr.msra.gmra.mrb[48].mxu1 %v1553_v26 }
 0x44d   :  { %2059 = vmatpush1.bf16.msra.mxu0 %v4225_v32  ;;  %2100 = vmatpush1.bf16.msra.mxu1 %v4355_v9 }
 0x44e   :  { %2060 = vmatprep.subr.bf16.mxu0 %v4232_v33  ;;  %2101 = vmatprep.subr.bf16.mxu1 %v4362_v19 }
 0x44f   :  { %2090 = vmatprep.mubr.bf16.mxu0 %v4755_v1  ;;  %2131 = vmatprep.mubr.bf16.mxu1 %v4755_v1 }
 0x451   :  { %2061 = vmatpush1.bf16.msra.mxu0 %v4237_v34  ;;  %2102 = vmatpush1.bf16.msra.mxu1 %v4367_v21 }
 0x452   :  { %2062 = vmatprep.subr.bf16.mxu0 %v4244_v35  ;;  %2103 = vmatprep.subr.bf16.mxu1 %v4374_v51 }
 0x455   :  { %2063 = vmatpush1.bf16.msra.mxu0 %v4249_v36  ;;  %2104 = vmatpush1.bf16.msra.mxu1 %v4379_v55 }
 0x456   :  { %2064 = vmatprep.subr.bf16.mxu0 %v4256_v37  ;;  %2105 = vmatprep.subr.bf16.mxu1 %v4386_v53 }
 0x459   :  { %2065 = vmatpush1.bf16.msra.mxu0 %v4261_v38  ;;  %2106 = vmatpush1.bf16.msra.mxu1 %v4391_v63 }
 0x45a   :  { %2066 = vmatprep.subr.bf16.mxu0 %v4267_v39  ;;  %2107 = vmatprep.subr.bf16.mxu1 %v4397_v61 }
 0x45d   :  { %2067 = vmatpush1.bf16.msra.mxu0 %v4273_v40  ;;  %2108 = vmatpush1.bf16.msra.mxu1 %v4403_v50 }
 0x45e   :  { %2068 = vmatprep.subr.bf16.mxu0 %v4279_v41  ;;  %2109 = vmatprep.subr.bf16.mxu1 %v4409_v59 }
 0x461   :  { %2069 = vmatpush1.bf16.msra.mxu0 %v4285_v42  ;;  %2110 = vmatpush1.bf16.msra.mxu1 %v4415_v0 }
 0x462   :  { %2070 = vmatprep.subr.bf16.mxu0 %v4291_v43  ;;  %2111 = vmatprep.subr.bf16.mxu1 %v4421_v4 }
 0x465   :  { %2071 = vmatpush1.bf16.msra.mxu0 %v4297_v44  ;;  %2112 = vmatpush1.bf16.msra.mxu1 %v4427_v6 }
 0x466   :  { %2072 = vmatprep.subr.bf16.mxu0 %v4303_v45  ;;  %2113 = vmatprep.subr.bf16.mxu1 %v4433_v8 }
 0x469   :  { %2073 = vmatpush1.bf16.msra.mxu0 %v4309_v2  ;;  %2114 = vmatpush1.bf16.msra.mxu1 %v4439_v12 }
 0x46a   :  { %2370 = vmatprep.subr.bf16.mxu0 %v4220_v31  ;;  %2411 = vmatprep.subr.bf16.mxu1 %v4350_v29 }
 0x51f   :  { %v1780_v17 = vpop.f32.mrb[16].mxu0  ;;  %v1821_v30 = vpop.f32.mrb[48].mxu1 }
 0x520   :  { %v1828_v28 = vadd.f32 %v1780_v17, %v4757_v58  ;;  %v1830_v7 = vadd.f32 %v1821_v30, %v4758_v46  ;;  %v1782_v10 = vpop.f32.mrb[17].mxu0  ;;  %v1823_v52 = vpop.f32.mrb[49].mxu1 }
 0x521   :  { %v1829_v57 = vadd.f32 %v1782_v10, %v4759_v60  ;;  %v1831_v48 = vadd.f32 %v1823_v52, %v4760_v62  ;;  %v1784_v31 = vpop.f32.mrb[18].mxu0  ;;  %v1825_v5 = vpop.f32.mrb[50].mxu1 }
 0x522   :  { %v3281_v11 = vmul.f32 -1.442695, %v1828_v28  ;;  %v1785_v49 = vpop.f32.mrb[19].mxu0  ;;  %v1826_v13 = vpop.f32.mrb[51].mxu1 }
 0x523   :  { %v3282_v14 = vmul.f32 -1.442695, %v1829_v57  ;;  %v3283_v16 = vmul.f32 -1.442695, %v1831_v48 }
 0x524   :  { %3645 = vpow2.f32 %v3281_v11 }
 0x525   :  { %3647 = vpow2.f32 %v3282_v14 }
 0x526   :  { %3649 = vpow2.f32 %v3283_v16 }
 0x527   :  { %3651 = vtanh.f32 %v1830_v7 }
 0x52e   :  { %v3646_v20 = vpop.eup %3645 }
 0x52f   :  { %v3648_v22 = vpop.eup %3647  ;;  %v1835_v18 = vadd.f32 1.0, %v3646_v20 }
 0x530   :  { %v1841_v23 = vadd.f32 1.0, %v3648_v22  ;;  %v3650_v26 = vpop.eup %3649 }
 0x531   :  { %3653 = vrcp.f32 %v1835_v18  ;;  %v3652_v54 = vpop.eup %3651  ;;  %v1848_v28 = vadd.f32 1.0, %v3650_v26 }
 0x532   :  { %3655 = vrcp.f32 %v1841_v23 }
 0x533   :  { %3657 = vrcp.f32 %v1848_v28  ;;  %v2837_v28 = vpop.permute.xlu1 %2836 }
 0x53b   :  { %v3654_v17 = vpop.eup %3653 }
 0x53c   :  { %v3656_v30 = vpop.eup %3655  ;;  %v1852_v58 = vmul.f32 %v3654_v17, %v3652_v54 }
 0x53d   :  { %v1851_v46 = vmul.f32 %v3656_v30, %v4452_v15  ;;  %v3658_v52 = vpop.eup %3657 }
 0x53f   :  { %v4504_v10 = vadd.f32 %v1852_v58, %v1851_v46  ;;  %v2832_v58 = vpop.permute.xlu0 %2831 }
 0x541   :  { %3659 = vtanh.f32 %v4504_v10 }
 0x54b   :  { %v3660_v60 = vpop.eup %3659 }
 0x54c   :  { %v4507_v57 = vmul.f32 %v3660_v60, %v3658_v52 }
 0x54e   :  { %v1865_v7 = vpack.c.bf16 %v4507_v57, %v4507_v57  ;;  %v4556_v52 = vmul.f32 %v2832_v58, %v4507_v57  ;;  %v2808_v57 = vld [vmem:[%s4731_s2 + $0x38] sm:$0xff] }
 0x54f   :  { %2846 = vperm.xlu1 %3436, %v2808_v57  }
 0x550   :  { %2091 = vmatmul.mubr.bf16.vlgmr.msra.gmra.mrb[20].mxu0 %v1865_v7  ;;  %2132 = vmatmul.mubr.bf16.vlgmr.msra.gmra.mrb[52].mxu1 %v1865_v7 }
 0x551   :  { %2371 = vmatpush1.bf16.msra.mxu0 %v4225_v32  ;;  %2412 = vmatpush1.bf16.msra.mxu1 %v4355_v9  ;;  %v2807_v32 = vld [vmem:[%s4731_s2 + $0x30] sm:$0xff] }
 0x552   :  { %2372 = vmatprep.subr.bf16.mxu0 %v4232_v33  ;;  %2413 = vmatprep.subr.bf16.mxu1 %v4362_v19 }
 0x553   :  { %2402 = vmatprep.mubr.bf16.mxu0 %v4755_v1  ;;  %2443 = vmatprep.mubr.bf16.mxu1 %v4755_v1 }
 0x554   :  { %2841 = vperm.xlu0 %3435, %v2807_v32  }
 0x555   :  { %2373 = vmatpush1.bf16.msra.mxu0 %v4237_v34  ;;  %2414 = vmatpush1.bf16.msra.mxu1 %v4367_v21 }
 0x556   :  { %2374 = vmatprep.subr.bf16.mxu0 %v4244_v35  ;;  %2415 = vmatprep.subr.bf16.mxu1 %v4374_v51  ;;  %v4761_v35 = vld [vmem:[#allocation6_spill] sm:$0xff] }
 0x559   :  { %2375 = vmatpush1.bf16.msra.mxu0 %v4249_v36  ;;  %2416 = vmatpush1.bf16.msra.mxu1 %v4379_v55 }
 0x55a   :  { %2376 = vmatprep.subr.bf16.mxu0 %v4256_v37  ;;  %2417 = vmatprep.subr.bf16.mxu1 %v4386_v53  ;;  %v4762_v37 = vld [vmem:[#allocation15_spill] sm:$0xff] }
 0x55d   :  { %2377 = vmatpush1.bf16.msra.mxu0 %v4261_v38  ;;  %2418 = vmatpush1.bf16.msra.mxu1 %v4391_v63 }
 0x55e   :  { %2378 = vmatprep.subr.bf16.mxu0 %v4267_v39  ;;  %2419 = vmatprep.subr.bf16.mxu1 %v4397_v61 }
 0x561   :  { %2379 = vmatpush1.bf16.msra.mxu0 %v4273_v40  ;;  %2420 = vmatpush1.bf16.msra.mxu1 %v4403_v50 }
 0x562   :  { %2380 = vmatprep.subr.bf16.mxu0 %v4279_v41  ;;  %2421 = vmatprep.subr.bf16.mxu1 %v4409_v59  ;;  %v4763_v41 = vld [vmem:[#allocation7_spill] sm:$0xff] }
 0x565   :  { %2381 = vmatpush1.bf16.msra.mxu0 %v4285_v42  ;;  %2422 = vmatpush1.bf16.msra.mxu1 %v4415_v0 }
 0x566   :  { %2382 = vmatprep.subr.bf16.mxu0 %v4291_v43  ;;  %2423 = vmatprep.subr.bf16.mxu1 %v4421_v4  ;;  %v4764_v43 = vld [vmem:[#allocation16_spill] sm:$0xff] }
 0x569   :  { %2383 = vmatpush1.bf16.msra.mxu0 %v4297_v44  ;;  %2424 = vmatpush1.bf16.msra.mxu1 %v4427_v6 }
 0x56a   :  { %2384 = vmatprep.subr.bf16.mxu0 %v4303_v45  ;;  %2425 = vmatprep.subr.bf16.mxu1 %v4433_v8 }
 0x56d   :  { %2385 = vmatpush1.bf16.msra.mxu0 %v4309_v2  ;;  %2426 = vmatpush1.bf16.msra.mxu1 %v4439_v12 }
 0x56e   :  { %2723 = vmatprep.subr.bf16.mxu1 %v4350_v29 }
 0x623   :  { %v2092_v33 = vpop.f32.mrb[20].mxu0  ;;  %v2133_v34 = vpop.f32.mrb[52].mxu1 }
 0x624   :  { %v2140_v36 = vadd.f32 %v2092_v33, %v4761_v35  ;;  %v2142_v38 = vadd.f32 %v2133_v34, %v4762_v37  ;;  %v2094_v39 = vpop.f32.mrb[21].mxu0  ;;  %v2135_v40 = vpop.f32.mrb[53].mxu1  ;;  %v4765_v35 = vld [vmem:[#allocation8_spill] sm:$0xff]  ;;  %v4766_v37 = vld [vmem:[#allocation17_spill] sm:$0xff] }
 0x625   :  { %v2141_v42 = vadd.f32 %v2094_v39, %v4763_v41  ;;  %v2143_v44 = vadd.f32 %v2135_v40, %v4764_v43  ;;  %v2096_v45 = vpop.f32.mrb[22].mxu0  ;;  %v2137_v2 = vpop.f32.mrb[54].mxu1  ;;  %v4767_v41 = vld [vmem:[#allocation9_spill] sm:$0xff]  ;;  %v4768_v43 = vld [vmem:[#allocation18_spill] sm:$0xff] }
 0x626   :  { %v3316_v29 = vmul.f32 -1.442695, %v2140_v36  ;;  %v2097_v15 = vpop.f32.mrb[23].mxu0  ;;  %v2138_v62 = vpop.f32.mrb[55].mxu1 }
 0x627   :  { %v3317_v48 = vmul.f32 -1.442695, %v2141_v42  ;;  %v3318_v31 = vmul.f32 -1.442695, %v2143_v44 }
 0x628   :  { %3661 = vpow2.f32 %v3316_v29 }
 0x629   :  { %3663 = vpow2.f32 %v3317_v48 }
 0x62a   :  { %3665 = vpow2.f32 %v3318_v31 }
 0x62b   :  { %3667 = vtanh.f32 %v2142_v38 }
 0x632   :  { %v3662_v5 = vpop.eup %3661 }
 0x633   :  { %v3664_v11 = vpop.eup %3663  ;;  %v2147_v49 = vadd.f32 1.0, %v3662_v5 }
 0x634   :  { %v2153_v13 = vadd.f32 1.0, %v3664_v11  ;;  %v3666_v14 = vpop.eup %3665 }
 0x635   :  { %3669 = vrcp.f32 %v2147_v49  ;;  %v3668_v16 = vpop.eup %3667  ;;  %v2160_v23 = vadd.f32 1.0, %v3666_v14 }
 0x636   :  { %3671 = vrcp.f32 %v2153_v13 }
 0x637   :  { %3673 = vrcp.f32 %v2160_v23 }
 0x63f   :  { %v3670_v20 = vpop.eup %3669 }
 0x640   :  { %v3672_v22 = vpop.eup %3671  ;;  %v2164_v18 = vmul.f32 %v3670_v20, %v3668_v16 }
 0x641   :  { %v2163_v26 = vmul.f32 %v3672_v22, %v4504_v10  ;;  %v3674_v17 = vpop.eup %3673  ;;  %v3573_v10 = vld [vmem:[%s4733_s5] sm:$0xff]  }
 0x643   :  { %v4552_v54 = vadd.f32 %v2164_v18, %v2163_v26 }
 0x645   :  { %3675 = vtanh.f32 %v4552_v54 }
 0x64f   :  { %v3676_v30 = vpop.eup %3675 }
 0x650   :  { %v2167_v46 = vmul.f32 %v3676_v30, %v3674_v17 }
 0x652   :  { %v2177_v60 = vpack.c.bf16 %v2167_v46, %v2167_v46  ;;  %v4558_v7 = vmul.f32 %v2837_v28, %v2167_v46 }
 0x654   :  { %v2859_v32 = vpack.c.bf16 %v4558_v7, %v4556_v52  ;;  %2403 = vmatmul.mubr.bf16.vlgmr.msra.gmra.mrb[24].mxu0 %v2177_v60  ;;  %2444 = vmatmul.mubr.bf16.vlgmr.msra.gmra.mrb[56].mxu1 %v2177_v60  ;;  %v3574_v60 = vld [vmem:[%s4733_s5 + $0x8] sm:$0xff]  }
 0x655   :  { %2724 = vmatpush1.bf16.msra.mxu1 %v4355_v9  ;;  %2714 = vmatprep.mubr.bf16.mxu0 %v4755_v1  ;;  %v3549_v9 = vld [vmem:[%s4729_s4] ss:$16 sps:$4 sm:$0xff]  }
 0x656   :  { %2725 = vmatprep.subr.bf16.mxu1 %v4362_v19  ;;  %2755 = vmatprep.mubr.bf16.mxu1 %v4755_v1  ;;  %v3551_v1 = vld [vmem:[%s4729_s4 + $0x4] ss:$16 sps:$4 sm:$0xff]  }
 0x657   :  { %2682 = vmatprep.subr.bf16.mxu0 %v3551_v1  ;;  %v3554_v19 = vld [vmem:[%s4729_s4 + $0x24] ss:$16 sps:$4 sm:$0xff]   ;;  %v3576_v1 = vld [vmem:[%s4733_s5 + $0x18] sm:$0xff]  }
 0x658   :  { %2683 = vmatpush1.bf16.msra.mxu0 %v3549_v9  ;;  %v3577_v9 = vld [vmem:[%s4733_s5 + $0x20] sm:$0xff]  }
 0x659   :  { %2726 = vmatpush1.bf16.msra.mxu1 %v4367_v21  ;;  %v3552_v21 = vld [vmem:[%s4729_s4 + $0x20] ss:$16 sps:$4 sm:$0xff]   ;;  %2684 = vmatprep.subr.bf16.mxu0 %v3554_v19 }
 0x65a   :  { %2727 = vmatprep.subr.bf16.mxu1 %v4374_v51  ;;  %v3557_v51 = vld [vmem:[%s4729_s4 + $0x44] ss:$16 sps:$4 sm:$0xff]  }
 0x65c   :  { %2685 = vmatpush1.bf16.msra.mxu0 %v3552_v21 }
 0x65d   :  { %2728 = vmatpush1.bf16.msra.mxu1 %v4379_v55  ;;  %v3555_v55 = vld [vmem:[%s4729_s4 + $0x40] ss:$16 sps:$4 sm:$0xff]   ;;  %2686 = vmatprep.subr.bf16.mxu0 %v3557_v51 }
 0x65e   :  { %2729 = vmatprep.subr.bf16.mxu1 %v4386_v53  ;;  %v3560_v53 = vld [vmem:[%s4729_s4 + $0x64] ss:$16 sps:$4 sm:$0xff]  }
 0x65f   :  { %v4769_v51 = vld [vmem:[#allocation10_spill] sm:$0xff] }
 0x660   :  { %2687 = vmatpush1.bf16.msra.mxu0 %v3555_v55 }
 0x661   :  { %2730 = vmatpush1.bf16.msra.mxu1 %v4391_v63  ;;  %v3558_v63 = vld [vmem:[%s4729_s4 + $0x60] ss:$16 sps:$4 sm:$0xff]   ;;  %2688 = vmatprep.subr.bf16.mxu0 %v3560_v53  ;;  %v4770_v53 = vld [vmem:[#allocation19_spill] sm:$0xff] }
 0x662   :  { %2731 = vmatprep.subr.bf16.mxu1 %v4397_v61  ;;  %v3561_v61 = vld [vmem:[%s4729_s4 + $0x80] ss:$16 sps:$4 sm:$0xff]  }
 0x664   :  { %2689 = vmatpush1.bf16.msra.mxu0 %v3558_v63 }
 0x665   :  { %2732 = vmatpush1.bf16.msra.mxu1 %v4403_v50  ;;  %v3563_v50 = vld [vmem:[%s4729_s4 + $0x84] ss:$16 sps:$4 sm:$0xff]  }
 0x666   :  { %2733 = vmatprep.subr.bf16.mxu1 %v4409_v59  ;;  %v3566_v59 = vld [vmem:[%s4729_s4 + $0xa4] ss:$16 sps:$4 sm:$0xff]   ;;  %2690 = vmatprep.subr.bf16.mxu0 %v3563_v50 }
 0x668   :  { %2691 = vmatpush1.bf16.msra.mxu0 %v3561_v61 }
 0x669   :  { %2734 = vmatpush1.bf16.msra.mxu1 %v4415_v0  ;;  %v3564_v0 = vld [vmem:[%s4729_s4 + $0xa0] ss:$16 sps:$4 sm:$0xff]   ;;  %2692 = vmatprep.subr.bf16.mxu0 %v3566_v59  ;;  %v4771_v59 = vld [vmem:[#allocation11_spill] sm:$0xff] }
 0x66a   :  { %2735 = vmatprep.subr.bf16.mxu1 %v4421_v4  ;;  %v3569_v4 = vld [vmem:[%s4729_s4 + $0xc4] ss:$16 sps:$4 sm:$0xff]  }
 0x66c   :  { %2693 = vmatpush1.bf16.msra.mxu0 %v3564_v0 }
 0x66d   :  { %2736 = vmatpush1.bf16.msra.mxu1 %v4427_v6  ;;  %v3567_v6 = vld [vmem:[%s4729_s4 + $0xc0] ss:$16 sps:$4 sm:$0xff]   ;;  %2694 = vmatprep.subr.bf16.mxu0 %v3569_v4 }
 0x66e   :  { %2737 = vmatprep.subr.bf16.mxu1 %v4433_v8  ;;  %v3572_v8 = vld [vmem:[%s4729_s4 + $0xe4] ss:$16 sps:$4 sm:$0xff]  }
 0x66f   :  { %v4772_v4 = vld [vmem:[#allocation20_spill] sm:$0xff] }
 0x670   :  { %2695 = vmatpush1.bf16.msra.mxu0 %v3567_v6 }
 0x671   :  { %2738 = vmatpush1.bf16.msra.mxu1 %v4439_v12  ;;  %v3570_v12 = vld [vmem:[%s4729_s4 + $0xe0] ss:$16 sps:$4 sm:$0xff]   ;;  %2696 = vmatprep.subr.bf16.mxu0 %v3572_v8 }
 0x674   :  { %2697 = vmatpush1.bf16.msra.mxu0 %v3570_v12 }
 0x675   :  { %3410 = vmatprep.subr.bf16.mxu0 %v3573_v10 }
 0x727   :  { %v2404_v33 = vpop.f32.mrb[24].mxu0  ;;  %v2445_v34 = vpop.f32.mrb[56].mxu1 }
 0x728   :  { %v2452_v36 = vadd.f32 %v2404_v33, %v4765_v35  ;;  %v2454_v38 = vadd.f32 %v2445_v34, %v4766_v37  ;;  %v2406_v39 = vpop.f32.mrb[25].mxu0  ;;  %v2447_v40 = vpop.f32.mrb[57].mxu1 }
 0x729   :  { %v2453_v42 = vadd.f32 %v2406_v39, %v4767_v41  ;;  %v2455_v44 = vadd.f32 %v2447_v40, %v4768_v43  ;;  %v2408_v45 = vpop.f32.mrb[26].mxu0  ;;  %v2449_v2 = vpop.f32.mrb[58].mxu1  ;;  %v3389_v41 = vld [vmem:[%s4734_s6] ss:$0 sm:$0xff] }
 0x72a   :  { %v3351_v29 = vmul.f32 -1.442695, %v2452_v36  ;;  %v2409_v15 = vpop.f32.mrb[27].mxu0  ;;  %v2450_v62 = vpop.f32.mrb[59].mxu1 }
 0x72b   :  { %v3352_v48 = vmul.f32 -1.442695, %v2453_v42  ;;  %v3353_v31 = vmul.f32 -1.442695, %v2455_v44 }
 0x72c   :  { %3677 = vpow2.f32 %v3351_v29 }
 0x72d   :  { %3679 = vpow2.f32 %v3352_v48 }
 0x72e   :  { %3681 = vpow2.f32 %v3353_v31 }
 0x72f   :  { %3683 = vtanh.f32 %v2454_v38 }
 0x736   :  { %v3678_v5 = vpop.eup %3677 }
 0x737   :  { %v3680_v11 = vpop.eup %3679  ;;  %v2459_v49 = vadd.f32 1.0, %v3678_v5 }
 0x738   :  { %v2465_v13 = vadd.f32 1.0, %v3680_v11  ;;  %v3682_v14 = vpop.eup %3681  ;;  %v2842_v11 = vpop.permute.xlu0 %2841 }
 0x739   :  { %3685 = vrcp.f32 %v2459_v49  ;;  %v3684_v16 = vpop.eup %3683  ;;  %v2472_v23 = vadd.f32 1.0, %v3682_v14 }
 0x73a   :  { %3687 = vrcp.f32 %v2465_v13  ;;  %v2847_v13 = vpop.permute.xlu1 %2846 }
 0x73b   :  { %3689 = vrcp.f32 %v2472_v23 }
 0x743   :  { %v3686_v20 = vpop.eup %3685 }
 0x744   :  { %v3688_v22 = vpop.eup %3687  ;;  %v2476_v18 = vmul.f32 %v3686_v20, %v3684_v16 }
 0x745   :  { %v2475_v26 = vmul.f32 %v3688_v22, %v4552_v54  ;;  %v3690_v30 = vpop.eup %3689  ;;  %v3575_v54 = vld [vmem:[%s4733_s5 + $0x10] sm:$0xff]  }
 0x747   :  { %v4638_v17 = vadd.f32 %v2476_v18, %v2475_v26 }
 0x749   :  { %3691 = vtanh.f32 %v4638_v17 }
 0x753   :  { %v3692_v58 = vpop.eup %3691 }
 0x754   :  { %v4641_v28 = vmul.f32 %v3692_v58, %v3690_v30 }
 0x756   :  { %v2489_v46 = vpack.c.bf16 %v4641_v28, %v4641_v28  ;;  %v2855_v14 = vmul.f32 %v2842_v11, %v4641_v28 }
 0x758   :  { %2715 = vmatmul.mubr.bf16.vlgmr.msra.gmra.mrb[28].mxu0 %v2489_v46  ;;  %2756 = vmatmul.mubr.bf16.vlgmr.msra.gmra.mrb[60].mxu1 %v2489_v46 }
 0x759   :  { %3411 = vmatpush3.bf16.msra.mxu0 %v3573_v10  ;;  %3426 = vmatprep.mubr.bf16.mxu0 %v2857_v25  ;;  %v3580_v25 = vld [vmem:[%s4733_s5 + $0x38] sm:$0xff]  }
 0x75a   :  { %3412 = vmatprep.subr.bf16.mxu0 %v3574_v60 }
 0x75d   :  { %3413 = vmatpush3.bf16.msra.mxu0 %v3574_v60 }
 0x75e   :  { %3414 = vmatprep.subr.bf16.mxu0 %v3575_v54 }
 0x761   :  { %3415 = vmatpush3.bf16.msra.mxu0 %v3575_v54 }
 0x762   :  { %3416 = vmatprep.subr.bf16.mxu0 %v3576_v1 }
 0x765   :  { %3417 = vmatpush3.bf16.msra.mxu0 %v3576_v1 }
 0x766   :  { %3418 = vmatprep.subr.bf16.mxu0 %v3577_v9 }
 0x769   :  { %3419 = vmatpush3.bf16.msra.mxu0 %v3577_v9 }
 0x76a   :  { %3420 = vmatprep.subr.bf16.mxu0 %v3578_v3 }
 0x76d   :  { %3421 = vmatpush3.bf16.msra.mxu0 %v3578_v3 }
 0x76e   :  { %3422 = vmatprep.subr.bf16.mxu0 %v3579_v47 }
 0x771   :  { %3423 = vmatpush3.bf16.msra.mxu0 %v3579_v47 }
 0x772   :  { %3424 = vmatprep.subr.bf16.mxu0 %v3580_v25 }
 0x775   :  { %3425 = vmatpush3.bf16.msra.mxu0 %v3580_v25 }
 0x778   :  { %3427 = vmatmul.mubr.bf16.vlgmr.msra.gmra.mrb[32].mxu0 %v2858_v56 }
 0x779   :  { %3430 = vmatprep.mubr.bf16.mxu0 %v2859_v32 }
 0x82b   :  { %v2716_v19 = vpop.f32.mrb[28].mxu0  ;;  %v2757_v21 = vpop.f32.mrb[60].mxu1 }
 0x82c   :  { %v2764_v55 = vadd.f32 %v2716_v19, %v4769_v51  ;;  %v2766_v63 = vadd.f32 %v2757_v21, %v4770_v53  ;;  %v2718_v61 = vpop.f32.mrb[29].mxu0  ;;  %v2759_v50 = vpop.f32.mrb[61].mxu1 }
 0x82d   :  { %v2765_v0 = vadd.f32 %v2718_v61, %v4771_v59  ;;  %v2767_v6 = vadd.f32 %v2759_v50, %v4772_v4  ;;  %v2720_v8 = vpop.f32.mrb[30].mxu0  ;;  %v2761_v12 = vpop.f32.mrb[62].mxu1 }
 0x82e   :  { %v3386_v24 = vmul.f32 -1.442695, %v2764_v55  ;;  %v2721_v27 = vpop.f32.mrb[31].mxu0  ;;  %v2762_v56 = vpop.f32.mrb[63].mxu1 }
 0x82f   :  { %v3387_v10 = vmul.f32 -1.442695, %v2765_v0  ;;  %v3388_v52 = vmul.f32 -1.442695, %v2767_v6 }
 0x830   :  { %3693 = vpow2.f32 %v3386_v24 }
 0x831   :  { %3695 = vpow2.f32 %v3387_v10 }
 0x832   :  { %3697 = vpow2.f32 %v3388_v52 }
 0x833   :  { %3699 = vtanh.f32 %v2766_v63 }
 0x83a   :  { %v3694_v7 = vpop.eup %3693 }
 0x83b   :  { %v3696_v32 = vpop.eup %3695  ;;  %v2771_v57 = vadd.f32 1.0, %v3694_v7 }
 0x83c   :  { %v2777_v33 = vadd.f32 1.0, %v3696_v32  ;;  %v3698_v34 = vpop.eup %3697 }
 0x83d   :  { %3701 = vrcp.f32 %v2771_v57  ;;  %v3700_v35 = vpop.eup %3699  ;;  %v2784_v39 = vadd.f32 1.0, %v3698_v34 }
 0x83e   :  { %3703 = vrcp.f32 %v2777_v33 }
 0x83f   :  { %3705 = vrcp.f32 %v2784_v39 }
 0x847   :  { %v3702_v36 = vpop.eup %3701 }
 0x848   :  { %v3704_v37 = vpop.eup %3703  ;;  %v2788_v38 = vmul.f32 %v3702_v36, %v3700_v35 }
 0x849   :  { %v2787_v40 = vmul.f32 %v3704_v37, %v4638_v17  ;;  %v3706_v31 = vpop.eup %3705 }
 0x84b   :  { %v3428_v42 = vpop.f32.mrb[32].mxu0  ;;  %v2789_v43 = vadd.f32 %v2788_v38, %v2787_v40 }
 0x84c   :  { %v2975_v44 = vadd.f32 %v3428_v42, %v3389_v41  ;;  %v2966_v45 = vpop.f32.mrb[33].mxu0 }
 0x84d   :  { %v3429_v2 = vpop.f32.mrb[34].mxu0  ;;  %3707 = vtanh.f32 %v2789_v43  ;;  %v2967_v62 = vadd.f32 %v3389_v41, %v2966_v45 }
 0x84e   :  { %3001 = vmax.xlane.f32.xlu0 %v2975_v44  ;;  %v2969_v29 = vpop.f32.mrb[35].mxu0  ;;  %v2978_v48 = vadd.f32 %v3429_v2, %v3389_v41 }
 0x84f   :  { %v2970_v15 = vadd.f32 %v3389_v41, %v2969_v29 }
 0x851   :  { %2999 = vmax.xlane.f32.xlu1 %v2970_v15 }
 0x852   :  { %2997 = vmax.xlane.f32.xlu0 %v2967_v62 }
 0x856   :  { %3003 = vmax.xlane.f32.xlu0 %v2978_v48 }
 0x857   :  { %v3708_v5 = vpop.eup %3707 }
 0x858   :  { %v2791_v49 = vmul.f32 %v3708_v5, %v3706_v31 }
 0x85a   :  { %v2856_v16 = vmul.f32 %v2847_v13, %v2791_v49 }
 0x85c   :  { %v2860_v20 = vpack.c.bf16 %v2856_v16, %v2855_v14 }
 0x85e   :  { %3431 = vmatmul.mubr.bf16.gmra.mrb[36].mxu0 %v2860_v20 }
 0x8db   :  { %v3002_v22 = vpop.xlane.xlu0 %3001 }
 0x8dc   :  { %v4688_v58 = vsub.f32 %v2975_v44, %v3002_v22 }
 0x8de   :  { %v3000_v23 = vpop.xlane.xlu1 %2999  ;;  %v3025_v1 = vmul.f32 1.442695, %v4688_v58 }
 0x8df   :  { %v2998_v18 = vpop.xlane.xlu0 %2997  ;;  %v4686_v17 = vsub.f32 %v2970_v15, %v3000_v23 }
 0x8e0   :  { %v4684_v26 = vsub.f32 %v2967_v62, %v2998_v18 }
 0x8e1   :  { %v3023_v60 = vmul.f32 1.442695, %v4686_v17 }
 0x8e2   :  { %v3021_v46 = vmul.f32 1.442695, %v4684_v26 }
 0x8e3   :  { %v3004_v30 = vpop.xlane.xlu0 %3003 }
 0x8e4   :  { %v4692_v54 = vsub.f32 %v2978_v48, %v3004_v30  ;;  %3709 = vpow2.f32 %v3021_v46 }
 0x8e5   :  { %3711 = vpow2.f32 %v3023_v60 }
 0x8e6   :  { %v3027_v25 = vmul.f32 1.442695, %v4692_v54  ;;  %3713 = vpow2.f32 %v3025_v1 }
 0x8e8   :  { %3715 = vpow2.f32 %v3027_v25 }
 0x8ee   :  { %v3710_v53 = vpop.eup %3709 }
 0x8ef   :  { %v3712_v63 = vpop.eup %3711 }
 0x8f0   :  { %v3714_v61 = vpop.eup %3713 }
 0x8f2   :  { %v3716_v50 = vpop.eup %3715 }
 0x931   :  { %v3432_v28 = vpop.f32.mrb[36].mxu0 }
 0x932   :  { %v2982_v9 = vpop.f32.mrb[37].mxu0  ;;  %v2991_v51 = vadd.f32 %v3432_v28, %v3389_v41 }
 0x933   :  { %v2983_v3 = vadd.f32 %v3389_v41, %v2982_v9  ;;  %v3433_v47 = vpop.f32.mrb[38].mxu0 }
 0x934   :  { %v2985_v19 = vpop.f32.mrb[39].mxu0  ;;  %v2994_v55 = vadd.f32 %v3433_v47, %v3389_v41 }
 0x935   :  { %v2986_v21 = vadd.f32 %v3389_v41, %v2985_v19  ;;  %3005 = vmax.xlane.f32.xlu1 %v2983_v3 }
 0x937   :  { %3007 = vmax.xlane.f32.xlu0 %v2986_v21 }
 0x939   :  { %3009 = vmax.xlane.f32.xlu1 %v2991_v51 }
 0x93b   :  { %3011 = vmax.xlane.f32.xlu0 %v2994_v55 }
 0x93d   :  { %3037 = vadd.xlane.f32.xlu1 %v3710_v53 }
 0x93f   :  { %3039 = vadd.xlane.f32.xlu0 %v3712_v63 }
 0x941   :  { %3041 = vadd.xlane.f32.xlu1 %v3714_v61 }
 0x943   :  { %3043 = vadd.xlane.f32.xlu0 %v3716_v50 }
 0x9c2   :  { %v3006_v59 = vpop.xlane.xlu1 %3005 }
 0x9c3   :  { %v3017_v0 = vsub.f32 %v2983_v3, %v3006_v59 }
 0x9c4   :  { %v3008_v4 = vpop.xlane.xlu0 %3007 }
 0x9c5   :  { %v3029_v6 = vmul.f32 1.442695, %v3017_v0  ;;  %v4696_v8 = vsub.f32 %v2986_v21, %v3008_v4 }
 0x9c6   :  { %v3010_v12 = vpop.xlane.xlu1 %3009 }
 0x9c7   :  { %3717 = vpow2.f32 %v3029_v6  ;;  %v3031_v24 = vmul.f32 1.442695, %v4696_v8  ;;  %v3019_v27 = vsub.f32 %v2991_v51, %v3010_v12 }
 0x9c8   :  { %v3012_v56 = vpop.xlane.xlu0 %3011 }
 0x9c9   :  { %3719 = vpow2.f32 %v3031_v24  ;;  %v3033_v10 = vmul.f32 1.442695, %v3019_v27  ;;  %v3020_v52 = vsub.f32 %v2994_v55, %v3012_v56 }
 0x9ca   :  { %v3038_v7 = vpop.xlane.xlu1 %3037 }
 0x9cb   :  { %3721 = vpow2.f32 %v3033_v10  ;;  %v3035_v32 = vmul.f32 1.442695, %v3020_v52 }
 0x9cc   :  { %3723 = vlog2.f32 %v3038_v7  ;;  %v3040_v57 = vpop.xlane.xlu0 %3039 }
 0x9cd   :  { %3725 = vpow2.f32 %v3035_v32 }
 0x9ce   :  { %3727 = vlog2.f32 %v3040_v57  ;;  %v3042_v33 = vpop.xlane.xlu1 %3041 }
 0x9cf   :  { %3729 = vlog2.f32 %v3042_v33 }
 0x9d0   :  { %v3044_v34 = vpop.xlane.xlu0 %3043 }
 0x9d1   :  { %v3718_v35 = vpop.eup %3717  ;;  %3731 = vlog2.f32 %v3044_v34 }
 0x9d2   :  { %3045 = vadd.xlane.f32.xlu1 %v3718_v35 }
 0x9d3   :  { %v3720_v36 = vpop.eup %3719 }
 0x9d4   :  { %3047 = vadd.xlane.f32.xlu0 %v3720_v36 }
 0x9d5   :  { %v3722_v37 = vpop.eup %3721 }
 0x9d6   :  { %v3724_v38 = vpop.eup %3723  ;;  %3049 = vadd.xlane.f32.xlu1 %v3722_v37 }
 0x9d7   :  { %v3726_v39 = vpop.eup %3725  ;;  %v3054_v40 = vmul.f32 0.6931472, %v3724_v38 }
 0x9d8   :  { %v3728_v41 = vpop.eup %3727  ;;  %3051 = vadd.xlane.f32.xlu0 %v3726_v39 }
 0x9d9   :  { %v3730_v42 = vpop.eup %3729  ;;  %v3069_v43 = vsub.f32 %v4684_v26, %v3054_v40  ;;  %v3056_v44 = vmul.f32 0.6931472, %v3728_v41 }
 0x9da   :  { %v3058_v45 = vmul.f32 0.6931472, %v3730_v42 }
 0x9db   :  { %v3732_v2 = vpop.eup %3731  ;;  %3077 = vst [vmem:[%s4735_s7] sm:$0xff] %v3069_v43  ;;  %v3070_v29 = vsub.f32 %v4686_v17, %v3056_v44 }
 0x9dc   :  { %v3071_v15 = vsub.f32 %v4688_v58, %v3058_v45  ;;  %v3060_v62 = vmul.f32 0.6931472, %v3732_v2 }
 0x9dd   :  { %3078 = vst [vmem:[%s4735_s7 + $0x8] sm:$0xff] %v3070_v29 }
 0x9de   :  { %3079 = vst [vmem:[%s4735_s7 + $0x10] sm:$0xff] %v3071_v15  ;;  %v3072_v48 = vsub.f32 %v4692_v54, %v3060_v62 }
 0x9e0   :  { %3080 = vst [vmem:[%s4735_s7 + $0x18] sm:$0xff] %v3072_v48 }
 0xa5f   :  { %v3046_v31 = vpop.xlane.xlu1 %3045 }
 0xa60   :  { %3733 = vlog2.f32 %v3046_v31 }
 0xa61   :  { %v3048_v5 = vpop.xlane.xlu0 %3047 }
 0xa62   :  { %3735 = vlog2.f32 %v3048_v5 }
 0xa63   :  { %v3050_v11 = vpop.xlane.xlu1 %3049 }
 0xa64   :  { %3737 = vlog2.f32 %v3050_v11 }
 0xa65   :  { %v3052_v49 = vpop.xlane.xlu0 %3051 }
 0xa66   :  { %3739 = vlog2.f32 %v3052_v49 }
 0xa6a   :  { %v3734_v13 = vpop.eup %3733 }
 0xa6b   :  { %v3062_v14 = vmul.f32 0.6931472, %v3734_v13 }
 0xa6c   :  { %v3736_v16 = vpop.eup %3735 }
 0xa6d   :  { %v3073_v20 = vsub.f32 %v3017_v0, %v3062_v14  ;;  %v3064_v22 = vmul.f32 0.6931472, %v3736_v16 }
 0xa6e   :  { %v3738_v18 = vpop.eup %3737 }
 0xa6f   :  { %3081 = vst [vmem:[%s4735_s7 + $0x20] sm:$0xff] %v3073_v20  ;;  %v3074_v23 = vsub.f32 %v4696_v8, %v3064_v22  ;;  %v3066_v26 = vmul.f32 0.6931472, %v3738_v18 }
 0xa70   :  { %v3740_v17 = vpop.eup %3739 }
 0xa71   :  { %3082 = vst [vmem:[%s4735_s7 + $0x28] sm:$0xff] %v3074_v23  ;;  %v3075_v30 = vsub.f32 %v3019_v27, %v3066_v26  ;;  %v3068_v58 = vmul.f32 0.6931472, %v3740_v17 }
 0xa73   :  { %3083 = vst [vmem:[%s4735_s7 + $0x30] sm:$0xff] %v3075_v30  ;;  %v3076_v46 = vsub.f32 %v3020_v52, %v3068_v58 }
 0xa75   :  { %3084 = vst [vmem:[%s4735_s7 + $0x38] sm:$0xff] %v3076_v46 }

</bundles_post_ra>
